<compile_context>
chip_gen: v6e
topology: v6e:2x2x1
jax: 0.10.0
libtpu: 0.0.40
codegen_flags: <defaults>
</compile_context>

<pallas_src>
import functools
import math

import jax
import jax.numpy as jnp
from jax.experimental import pallas as pl
from jax.experimental.pallas import tpu as pltpu


# ----------------------------- fused kernel --------------------------------

def _encoder_kernel(*refs, Bb, L, D, H, eps, has_mask):
    if has_mask:
        (x_ref, pe_ref, mask_ref,
         in_w_ref, in_b_ref, out_w_ref, out_b_ref,
         ff1_w_ref, ff1_b_ref, ff2_w_ref, ff2_b_ref,
         ln1_g_ref, ln1_b_ref, ln2_g_ref, ln2_b_ref,
         fin_g_ref, fin_b_ref,
         o_ref, x_sc) = refs
    else:
        (x_ref, pe_ref,
         in_w_ref, in_b_ref, out_w_ref, out_b_ref,
         ff1_w_ref, ff1_b_ref, ff2_w_ref, ff2_b_ref,
         ln1_g_ref, ln1_b_ref, ln2_g_ref, ln2_b_ref,
         fin_g_ref, fin_b_ref,
         o_ref, x_sc) = refs
        mask_ref = None

    hd = D // H
    R = Bb * L                       # rows of the resident activation (batch-major)
    scale = 1.0 / math.sqrt(hd)
    layer = pl.program_id(1)

    # ---- layer 0 of this batch block: load input + positional embedding ----
    @pl.when(layer == 0)
    def _():
        x3 = x_ref[...].astype(jnp.float32) + pe_ref[...][None].astype(jnp.float32)
        x_sc[...] = x3.reshape(R, D)

    def layer_norm(x, g, b):
        # PyTorch LayerNorm: biased variance, eps inside rsqrt, f32 stats.
        mu = jnp.mean(x, axis=-1, keepdims=True)
        var = jnp.mean(jnp.square(x - mu), axis=-1, keepdims=True)
        return (x - mu) * jax.lax.rsqrt(var + eps) * g + b

    def matmul(x, w):
        # bf16 operands on the MXU, f32 accumulation.
        return jnp.dot(x.astype(jnp.bfloat16), w,
                       preferred_element_type=jnp.float32)

    # bind small parameters (f32 casts) once per grid step
    in_b = in_b_ref[...].astype(jnp.float32)
    out_b = out_b_ref[...].astype(jnp.float32)
    ff1_b = ff1_b_ref[...].astype(jnp.float32)
    ff2_b = ff2_b_ref[...].astype(jnp.float32)
    ln1_g = ln1_g_ref[...].astype(jnp.float32)
    ln1_b = ln1_b_ref[...].astype(jnp.float32)
    ln2_g = ln2_g_ref[...].astype(jnp.float32)
    ln2_b = ln2_b_ref[...].astype(jnp.float32)

    x2d = x_sc[...]                                       # (R, D) f32, rows (b, l)

    # ---------------- self-attention block (post-norm) ----------------
    qkv = matmul(x2d, in_w_ref[...]) + in_b               # (R, 3D)

    # single full-width slices (no per-head slicing of the 3D-wide tensor)
    q = qkv[:, :D] * scale                                # scale folded into q
    k = qkv[:, D:2 * D]
    v = qkv[:, 2 * D:]

    # merge (head, batch) into one leading batch dim Z = H*Bb via leading-axis
    # concatenation (no lane-axis shuffles / 4-D transposes).
    def to_heads(t):
        return jnp.concatenate(
            [t[:, h * hd:(h + 1) * hd].reshape(Bb, L, hd) for h in range(H)],
            axis=0)                                       # (H*Bb, L, hd)

    qs = to_heads(q).astype(jnp.bfloat16)
    ks = to_heads(k).astype(jnp.bfloat16)
    vs = to_heads(v).astype(jnp.bfloat16)

    # one MXU pass for all heads / batch elements
    s = jnp.einsum('zqd,zkd->zqk', qs, ks,
                   preferred_element_type=jnp.float32)    # (Z, L, L)

    if has_mask:
        mask = mask_ref[...].astype(jnp.float32)
    else:
        # causal additive mask generated in-kernel (no DMA, no resident VMEM)
        row = jax.lax.broadcasted_iota(jnp.int32, (L, L), 0)
        col = jax.lax.broadcasted_iota(jnp.int32, (L, L), 1)
        mask = jnp.where(row >= col, 0.0, -1e9).astype(jnp.float32)
    s = s + mask[None]

    # one softmax for all heads / batch elements
    s = s - jnp.max(s, axis=-1, keepdims=True)
    p = jnp.exp(s)
    p = p * pl.reciprocal(jnp.sum(p, axis=-1, keepdims=True), approx=True)

    o = jnp.einsum('zqk,zkd->zqd', p.astype(jnp.bfloat16), vs,
                   preferred_element_type=jnp.float32)    # (Z, L, hd)

    # heads back onto the lane axis (single concat)
    attn = jnp.concatenate(
        [o[h * Bb:(h + 1) * Bb].reshape(R, hd) for h in range(H)], axis=-1)

    attn = matmul(attn, out_w_ref[...]) + out_b
    x2d = layer_norm(x2d + attn, ln1_g, ln1_b)

    # ---------------------- feed-forward block -------------------------
    h1 = jnp.maximum(matmul(x2d, ff1_w_ref[...]) + ff1_b, 0.0)
    ff = matmul(h1, ff2_w_ref[...]) + ff2_b
    x2d = layer_norm(x2d + ff, ln2_g, ln2_b)

    x_sc[...] = x2d

    # ---- last layer: final LayerNorm + direct seq-first (L, Bb, D) write ----
    @pl.when(layer == pl.num_programs(1) - 1)
    def _():
        y = layer_norm(x2d,
                       fin_g_ref[...].astype(jnp.float32),
                       fin_b_ref[...].astype(jnp.float32))       # (R, D), rows (b, l)
        for b in range(Bb):                                      # small static unroll
            o_ref[:, b, :] = y[b * L:(b + 1) * L, :].astype(o_ref.dtype)


# ------------------------------ model wrapper -------------------------------

def init_params(key, d_model, nhead, dim_ff, num_layers, length):
    """Per-layer weights stacked along a leading layer axis; matmul weights in
    bf16 (MXU), biases / LN params in f32."""
    keys = jax.random.split(key, 1 + num_layers)
    s_in = 1.0 / math.sqrt(d_model)
    s_ff = 1.0 / math.sqrt(dim_ff)

    in_w, out_w, ff1_w, ff2_w = [], [], [], []
    for l in range(num_layers):
        k = jax.random.split(keys[1 + l], 4)
        in_w.append(s_in * jax.random.normal(k[0], (d_model, 3 * d_model), jnp.float32))
        out_w.append(s_in * jax.random.normal(k[1], (d_model, d_model), jnp.float32))
        ff1_w.append(s_in * jax.random.normal(k[2], (d_model, dim_ff), jnp.float32))
        ff2_w.append(s_ff * jax.random.normal(k[3], (dim_ff, d_model), jnp.float32))

    nl = num_layers
    return {
        "pe": 0.001 * jax.random.normal(keys[0], (length, d_model), jnp.float32),
        "in_proj_w": jnp.stack(in_w).astype(jnp.bfloat16),      # (nl, D, 3D)
        "in_proj_b": jnp.zeros((nl, 1, 3 * d_model), jnp.float32),
        "out_w": jnp.stack(out_w).astype(jnp.bfloat16),          # (nl, D, D)
        "out_b": jnp.zeros((nl, 1, d_model), jnp.float32),
        "ff1_w": jnp.stack(ff1_w).astype(jnp.bfloat16),          # (nl, D, F)
        "ff1_b": jnp.zeros((nl, 1, dim_ff), jnp.float32),
        "ff2_w": jnp.stack(ff2_w).astype(jnp.bfloat16),          # (nl, F, D)
        "ff2_b": jnp.zeros((nl, 1, d_model), jnp.float32),
        "ln1_g": jnp.ones((nl, 1, d_model), jnp.float32),
        "ln1_b": jnp.zeros((nl, 1, d_model), jnp.float32),
        "ln2_g": jnp.ones((nl, 1, d_model), jnp.float32),
        "ln2_b": jnp.zeros((nl, 1, d_model), jnp.float32),
        "final_ln_g": jnp.ones((1, d_model), jnp.float32),
        "final_ln_b": jnp.zeros((1, d_model), jnp.float32),
    }


def _pick_batch_block(B):
    # Batch blocks feed the 'parallel' grid axis (v7x megacore).  The output
    # BlockSpec (L, Bb, D) needs Bb == B or Bb a multiple of 8 to stay within
    # the (8, 128) block-shape rules; small batches run as a single block.
    if B >= 16 and B % 8 == 0:
        return 8
    return B


def transformer_forward(params, x, mask=None, *, nhead):
    """x: (B, L, D).  mask=None -> causal mask generated in-kernel; otherwise
    an additive float (L, L) mask is DMA'd in (PyTorch attn_mask semantics).
    Returns (L, B, D), matching the PyTorch module's seq-first output."""
    B, L, D = x.shape
    F = params["ff1_w"].shape[-1]
    nl = params["in_proj_w"].shape[0]
    Bb = _pick_batch_block(B)
    assert B % Bb == 0 and D % nhead == 0
    has_mask = mask is not None

    # dropout `self.d` / in-layer dropouts are identity at inference.
    # TODO(synk): training-mode dropout is not implemented (inference semantics).

    kernel = functools.partial(_encoder_kernel, Bb=Bb, L=L, D=D, H=nhead,
                               eps=1e-5, has_mask=has_mask)

    def layer_spec(*tail):
        # squeezed leading layer axis -> 2-D refs inside the kernel
        return pl.BlockSpec((None,) + tail,
                            lambda b, l, _n=len(tail): (l,) + (0,) * _n)

    in_specs = [
        pl.BlockSpec((Bb, L, D), lambda b, l: (b, 0, 0)),   # x
        pl.BlockSpec((L, D), lambda b, l: (0, 0)),          # pe
    ]
    inputs = [x, params["pe"]]
    if has_mask:
        in_specs.append(pl.BlockSpec((L, L), lambda b, l: (0, 0)))
        inputs.append(mask)

    in_specs += [
        layer_spec(D, 3 * D),                               # in_proj_w
        layer_spec(1, 3 * D),                               # in_proj_b
        layer_spec(D, D),                                   # out_w
        layer_spec(1, D),                                   # out_b
        layer_spec(D, F),                                   # ff1_w
        layer_spec(1, F),                                   # ff1_b
        layer_spec(F, D),                                   # ff2_w
        layer_spec(1, D),                                   # ff2_b
        layer_spec(1, D), layer_spec(1, D),                 # ln1_g, ln1_b
        layer_spec(1, D), layer_spec(1, D),                 # ln2_g, ln2_b
        pl.BlockSpec((1, D), lambda b, l: (0, 0)),          # final_ln_g
        pl.BlockSpec((1, D), lambda b, l: (0, 0)),          # final_ln_b
    ]
    inputs += [params["in_proj_w"], params["in_proj_b"],
               params["out_w"], params["out_b"],
               params["ff1_w"], params["ff1_b"],
               params["ff2_w"], params["ff2_b"],
               params["ln1_g"], params["ln1_b"],
               params["ln2_g"], params["ln2_b"],
               params["final_ln_g"], params["final_ln_b"]]

    # VMEM budget from the actual buffers (weights double-buffered, resident
    # activations, f32 intermediates), with headroom; capped for v7x's 64 MiB.
    R = Bb * L
    weights = (D * 3 * D + D * D + D * F + F * D) * 2 * 2              # bf16, x2 buffers
    smalls = (3 * D + D + F + D + 4 * D + 2 * D) * 4 * 2
    io = (Bb * L * D) * 4 * 4 + L * D * 4 + (L * L * 4 if has_mask else 0)
    inter = (R * 3 * D + R * F + nhead * Bb * L * L * 2 + 3 * R * D) * 4
    est = weights + smalls + io + inter + R * D * 4
    vmem_limit = int(min(64 << 20, max(16 << 20, 4 * est)))

    out = pl.pallas_call(
        kernel,
        out_shape=jax.ShapeDtypeStruct((L, B, D), x.dtype),
        grid_spec=pltpu.PrefetchScalarGridSpec(
            num_scalar_prefetch=0,
            grid=(B // Bb, nl),
            in_specs=in_specs,
            out_specs=pl.BlockSpec((L, Bb, D), lambda b, l: (0, b, 0)),
            scratch_shapes=[pltpu.VMEM((Bb * L, D), jnp.float32)],
        ),
        compiler_params=pltpu.CompilerParams(
            # batch axis parallel (v7x megacore); layer axis is a dependency chain
            dimension_semantics=("parallel", "arbitrary"),
            vmem_limit_bytes=vmem_limit,
        ),
    )(*inputs)

    return out   # (L, B, D) seq-first, written directly by the kernel


# ---------------------------------- main ------------------------------------

if __name__ == "__main__":
    d_model, nhead, dim_ff, num_layers = 32, 4, 64, 2
    B, L = 2, 8  # length = 8

    key = jax.random.PRNGKey(0)
    k_param, k_x = jax.random.split(key)

    params = init_params(k_param, d_model, nhead, dim_ff, num_layers, L)
    x = jax.random.normal(k_x, (B, L, d_model), jnp.float32)

    # causal additive mask generated inside the kernel (mask=None); an explicit
    # float (L, L) attn_mask can be passed instead for full module generality.
    out = transformer_forward(params, x, mask=None, nhead=nhead)
    out = jax.block_until_ready(out)

    assert out.shape == (L, B, d_model), out.shape
    assert bool(jnp.all(jnp.isfinite(out)))
    print("KERNEL_OK")
</pallas_src>

<mosaic_0001>
module attributes {stable_mosaic.version = 11 : i64} {
  func.func @_encoder_kernel(%arg0: i32, %arg1: i32, %arg2: memref<2x8x32xf32, #tpu.memory_space<vmem>>, %arg3: memref<8x32xf32, #tpu.memory_space<vmem>>, %arg4: memref<1x32x96xbf16, #tpu.memory_space<vmem>>, %arg5: memref<1x1x96xf32, #tpu.memory_space<vmem>>, %arg6: memref<1x32x32xbf16, #tpu.memory_space<vmem>>, %arg7: memref<1x1x32xf32, #tpu.memory_space<vmem>>, %arg8: memref<1x32x64xbf16, #tpu.memory_space<vmem>>, %arg9: memref<1x1x64xf32, #tpu.memory_space<vmem>>, %arg10: memref<1x64x32xbf16, #tpu.memory_space<vmem>>, %arg11: memref<1x1x32xf32, #tpu.memory_space<vmem>>, %arg12: memref<1x1x32xf32, #tpu.memory_space<vmem>>, %arg13: memref<1x1x32xf32, #tpu.memory_space<vmem>>, %arg14: memref<1x1x32xf32, #tpu.memory_space<vmem>>, %arg15: memref<1x1x32xf32, #tpu.memory_space<vmem>>, %arg16: memref<1x32xf32, #tpu.memory_space<vmem>>, %arg17: memref<1x32xf32, #tpu.memory_space<vmem>>, %arg18: memref<8x2x32xf32, #tpu.memory_space<vmem>>, %arg19: memref<16x32xf32, #tpu.memory_space<vmem>>) attributes {dimension_semantics = [#tpu.dimension_semantics<parallel>, #tpu.dimension_semantics<arbitrary>], iteration_bounds = array<i64: 1, 2>, scalar_prefetch = 0 : i64, scratch_operands = 1 : i64, tpu.core_type = #tpu.core_type<tc>, window_params = [{transform_indices = @transform_0, window_bounds = array<i64: 2, 8, 32>}, {pipeline_mode = #tpu.pipeline_mode<synchronous>, transform_indices = @transform_1, window_bounds = array<i64: 8, 32>}, {transform_indices = @transform_2, window_bounds = array<i64: 1, 32, 96>}, {transform_indices = @transform_3, window_bounds = array<i64: 1, 1, 96>}, {transform_indices = @transform_4, window_bounds = array<i64: 1, 32, 32>}, {transform_indices = @transform_5, window_bounds = array<i64: 1, 1, 32>}, {transform_indices = @transform_6, window_bounds = array<i64: 1, 32, 64>}, {transform_indices = @transform_7, window_bounds = array<i64: 1, 1, 64>}, {transform_indices = @transform_8, window_bounds = array<i64: 1, 64, 32>}, {transform_indices = @transform_9, window_bounds = array<i64: 1, 1, 32>}, {transform_indices = @transform_10, window_bounds = array<i64: 1, 1, 32>}, {transform_indices = @transform_11, window_bounds = array<i64: 1, 1, 32>}, {transform_indices = @transform_12, window_bounds = array<i64: 1, 1, 32>}, {transform_indices = @transform_13, window_bounds = array<i64: 1, 1, 32>}, {pipeline_mode = #tpu.pipeline_mode<synchronous>, transform_indices = @transform_14, window_bounds = array<i64: 1, 32>}, {pipeline_mode = #tpu.pipeline_mode<synchronous>, transform_indices = @transform_15, window_bounds = array<i64: 1, 32>}, {transform_indices = @transform_16, window_bounds = array<i64: 8, 2, 32>}]} {
    %c0_i32 = arith.constant 0 : i32
    %0 = arith.cmpi eq, %arg1, %c0_i32 : i32
    %1 = arith.extui %0 : i1 to i32
    %c0_i32_0 = arith.constant 0 : i32
    %2 = arith.cmpi ne, %1, %c0_i32_0 : i32
    scf.if %2 {
      %c0_62 = arith.constant 0 : index
      %c0_63 = arith.constant 0 : index
      %c0_64 = arith.constant 0 : index
      %162 = vector.load %arg2[%c0_62, %c0_63, %c0_64] : memref<2x8x32xf32, #tpu.memory_space<vmem>>, vector<2x8x32xf32>
      %c0_65 = arith.constant 0 : index
      %c0_66 = arith.constant 0 : index
      %163 = vector.load %arg3[%c0_65, %c0_66] : memref<8x32xf32, #tpu.memory_space<vmem>>, vector<8x32xf32>
      %164 = vector.shape_cast %163 : vector<8x32xf32> to vector<1x8x32xf32>
      %165 = vector.broadcast %164 : vector<1x8x32xf32> to vector<2x8x32xf32>
      %166 = arith.addf %162, %165 : vector<2x8x32xf32>
      %167 = vector.shape_cast %166 : vector<2x8x32xf32> to vector<16x32xf32>
      %c0_67 = arith.constant 0 : index
      %c0_68 = arith.constant 0 : index
      %168 = vector.load %arg19[%c0_67, %c0_68] : memref<16x32xf32, #tpu.memory_space<vmem>>, vector<16x32xf32>
      tpu.vector_store %arg19[%c0_67, %c0_68], %167 {strides = array<i32>} : memref<16x32xf32, #tpu.memory_space<vmem>>, vector<16x32xf32>,
    } else {
    }
    %c0 = arith.constant 0 : index
    %c0_1 = arith.constant 0 : index
    %c0_2 = arith.constant 0 : index
    %3 = vector.load %arg5[%c0, %c0_1, %c0_2] : memref<1x1x96xf32, #tpu.memory_space<vmem>>, vector<1x1x96xf32>
    %4 = vector.shape_cast %3 : vector<1x1x96xf32> to vector<1x96xf32>
    %c0_3 = arith.constant 0 : index
    %c0_4 = arith.constant 0 : index
    %c0_5 = arith.constant 0 : index
    %5 = vector.load %arg7[%c0_3, %c0_4, %c0_5] : memref<1x1x32xf32, #tpu.memory_space<vmem>>, vector<1x1x32xf32>
    %6 = vector.shape_cast %5 : vector<1x1x32xf32> to vector<1x32xf32>
    %c0_6 = arith.constant 0 : index
    %c0_7 = arith.constant 0 : index
    %c0_8 = arith.constant 0 : index
    %7 = vector.load %arg9[%c0_6, %c0_7, %c0_8] : memref<1x1x64xf32, #tpu.memory_space<vmem>>, vector<1x1x64xf32>
    %8 = vector.shape_cast %7 : vector<1x1x64xf32> to vector<1x64xf32>
    %c0_9 = arith.constant 0 : index
    %c0_10 = arith.constant 0 : index
    %c0_11 = arith.constant 0 : index
    %9 = vector.load %arg11[%c0_9, %c0_10, %c0_11] : memref<1x1x32xf32, #tpu.memory_space<vmem>>, vector<1x1x32xf32>
    %10 = vector.shape_cast %9 : vector<1x1x32xf32> to vector<1x32xf32>
    %c0_12 = arith.constant 0 : index
    %c0_13 = arith.constant 0 : index
    %c0_14 = arith.constant 0 : index
    %11 = vector.load %arg12[%c0_12, %c0_13, %c0_14] : memref<1x1x32xf32, #tpu.memory_space<vmem>>, vector<1x1x32xf32>
    %12 = vector.shape_cast %11 : vector<1x1x32xf32> to vector<1x32xf32>
    %c0_15 = arith.constant 0 : index
    %c0_16 = arith.constant 0 : index
    %c0_17 = arith.constant 0 : index
    %13 = vector.load %arg13[%c0_15, %c0_16, %c0_17] : memref<1x1x32xf32, #tpu.memory_space<vmem>>, vector<1x1x32xf32>
    %14 = vector.shape_cast %13 : vector<1x1x32xf32> to vector<1x32xf32>
    %c0_18 = arith.constant 0 : index
    %c0_19 = arith.constant 0 : index
    %c0_20 = arith.constant 0 : index
    %15 = vector.load %arg14[%c0_18, %c0_19, %c0_20] : memref<1x1x32xf32, #tpu.memory_space<vmem>>, vector<1x1x32xf32>
    %16 = vector.shape_cast %15 : vector<1x1x32xf32> to vector<1x32xf32>
    %c0_21 = arith.constant 0 : index
    %c0_22 = arith.constant 0 : index
    %c0_23 = arith.constant 0 : index
    %17 = vector.load %arg15[%c0_21, %c0_22, %c0_23] : memref<1x1x32xf32, #tpu.memory_space<vmem>>, vector<1x1x32xf32>
    %18 = vector.shape_cast %17 : vector<1x1x32xf32> to vector<1x32xf32>
    %c0_24 = arith.constant 0 : index
    %c0_25 = arith.constant 0 : index
    %19 = vector.load %arg19[%c0_24, %c0_25] : memref<16x32xf32, #tpu.memory_space<vmem>>, vector<16x32xf32>
    %c0_26 = arith.constant 0 : index
    %c0_27 = arith.constant 0 : index
    %c0_28 = arith.constant 0 : index
    %20 = vector.load %arg4[%c0_26, %c0_27, %c0_28] : memref<1x32x96xbf16, #tpu.memory_space<vmem>>, vector<1x32x96xbf16>
    %21 = vector.shape_cast %20 : vector<1x32x96xbf16> to vector<32x96xbf16>
    %22 = arith.truncf %19 : vector<16x32xf32> to vector<16x32xbf16>
    %cst = arith.constant dense<0.000000e+00> : vector<16x96xf32>
    %23 = tpu.matmul %22, %21, %cst {dimension_numbers = #tpu.dot_dimension_numbers<[1], [0], [0], [1], [0, 0, 1, 1], [], []>} : vector<16x32xbf16>, vector<32x96xbf16>, vector<16x96xf32> -> vector<16x96xf32>
    %24 = vector.broadcast %4 : vector<1x96xf32> to vector<16x96xf32>
    %25 = arith.addf %23, %24 : vector<16x96xf32>
    %26 = vector.extract_strided_slice %25 {offsets = [0, 0], sizes = [16, 32], strides = [1, 1]} : vector<16x96xf32> to vector<16x32xf32>
    %cst_29 = arith.constant 0.353553385 : f32
    %27 = vector.broadcast %cst_29 : f32 to vector<16x32xf32>
    %28 = arith.mulf %26, %27 : vector<16x32xf32>
    %29 = vector.extract_strided_slice %25 {offsets = [0, 32], sizes = [16, 32], strides = [1, 1]} : vector<16x96xf32> to vector<16x32xf32>
    %30 = vector.extract_strided_slice %25 {offsets = [0, 64], sizes = [16, 32], strides = [1, 1]} : vector<16x96xf32> to vector<16x32xf32>
    %31 = vector.extract_strided_slice %28 {offsets = [0, 0], sizes = [16, 8], strides = [1, 1]} : vector<16x32xf32> to vector<16x8xf32>
    %32 = vector.shape_cast %31 : vector<16x8xf32> to vector<2x8x8xf32>
    %33 = vector.extract_strided_slice %28 {offsets = [0, 8], sizes = [16, 8], strides = [1, 1]} : vector<16x32xf32> to vector<16x8xf32>
    %34 = vector.shape_cast %33 : vector<16x8xf32> to vector<2x8x8xf32>
    %35 = vector.extract_strided_slice %28 {offsets = [0, 16], sizes = [16, 8], strides = [1, 1]} : vector<16x32xf32> to vector<16x8xf32>
    %36 = vector.shape_cast %35 : vector<16x8xf32> to vector<2x8x8xf32>
    %37 = vector.extract_strided_slice %28 {offsets = [0, 24], sizes = [16, 8], strides = [1, 1]} : vector<16x32xf32> to vector<16x8xf32>
    %38 = vector.shape_cast %37 : vector<16x8xf32> to vector<2x8x8xf32>
    %39 = tpu.concatenate %32, %34, %36, %38 in 0 : vector<2x8x8xf32>, vector<2x8x8xf32>, vector<2x8x8xf32>, vector<2x8x8xf32> -> vector<8x8x8xf32>
    %40 = arith.truncf %39 : vector<8x8x8xf32> to vector<8x8x8xbf16>
    %41 = vector.extract_strided_slice %29 {offsets = [0, 0], sizes = [16, 8], strides = [1, 1]} : vector<16x32xf32> to vector<16x8xf32>
    %42 = vector.shape_cast %41 : vector<16x8xf32> to vector<2x8x8xf32>
    %43 = vector.extract_strided_slice %29 {offsets = [0, 8], sizes = [16, 8], strides = [1, 1]} : vector<16x32xf32> to vector<16x8xf32>
    %44 = vector.shape_cast %43 : vector<16x8xf32> to vector<2x8x8xf32>
    %45 = vector.extract_strided_slice %29 {offsets = [0, 16], sizes = [16, 8], strides = [1, 1]} : vector<16x32xf32> to vector<16x8xf32>
    %46 = vector.shape_cast %45 : vector<16x8xf32> to vector<2x8x8xf32>
    %47 = vector.extract_strided_slice %29 {offsets = [0, 24], sizes = [16, 8], strides = [1, 1]} : vector<16x32xf32> to vector<16x8xf32>
    %48 = vector.shape_cast %47 : vector<16x8xf32> to vector<2x8x8xf32>
    %49 = tpu.concatenate %42, %44, %46, %48 in 0 : vector<2x8x8xf32>, vector<2x8x8xf32>, vector<2x8x8xf32>, vector<2x8x8xf32> -> vector<8x8x8xf32>
    %50 = arith.truncf %49 : vector<8x8x8xf32> to vector<8x8x8xbf16>
    %51 = vector.extract_strided_slice %30 {offsets = [0, 0], sizes = [16, 8], strides = [1, 1]} : vector<16x32xf32> to vector<16x8xf32>
    %52 = vector.shape_cast %51 : vector<16x8xf32> to vector<2x8x8xf32>
    %53 = vector.extract_strided_slice %30 {offsets = [0, 8], sizes = [16, 8], strides = [1, 1]} : vector<16x32xf32> to vector<16x8xf32>
    %54 = vector.shape_cast %53 : vector<16x8xf32> to vector<2x8x8xf32>
    %55 = vector.extract_strided_slice %30 {offsets = [0, 16], sizes = [16, 8], strides = [1, 1]} : vector<16x32xf32> to vector<16x8xf32>
    %56 = vector.shape_cast %55 : vector<16x8xf32> to vector<2x8x8xf32>
    %57 = vector.extract_strided_slice %30 {offsets = [0, 24], sizes = [16, 8], strides = [1, 1]} : vector<16x32xf32> to vector<16x8xf32>
    %58 = vector.shape_cast %57 : vector<16x8xf32> to vector<2x8x8xf32>
    %59 = tpu.concatenate %52, %54, %56, %58 in 0 : vector<2x8x8xf32>, vector<2x8x8xf32>, vector<2x8x8xf32>, vector<2x8x8xf32> -> vector<8x8x8xf32>
    %60 = arith.truncf %59 : vector<8x8x8xf32> to vector<8x8x8xbf16>
    "tpu.trace_start"() <{level = 10 : i32, message = "zqd,zkd->zqk"}> : () -> ()
    %cst_30 = arith.constant dense<0.000000e+00> : vector<8x8x8xf32>
    %61 = tpu.matmul %40, %50, %cst_30 {dimension_numbers = #tpu.dot_dimension_numbers<[2], [2], [1], [1], [0, 0, 0, 1, 1, 1], [0], [0]>} : vector<8x8x8xbf16>, vector<8x8x8xbf16>, vector<8x8x8xf32> -> vector<8x8x8xf32>
    "tpu.trace_stop"() : () -> ()
    %62 = tpu.iota {dimensions = array<i32: 0>} : vector<8x8xi32>
    %63 = tpu.iota {dimensions = array<i32: 1>} : vector<8x8xi32>
    %64 = arith.cmpi sge, %62, %63 : vector<8x8xi32>
    %cst_31 = arith.constant 0.000000e+00 : f32
    %cst_32 = arith.constant -1.000000e+09 : f32
    %65 = vector.broadcast %cst_31 : f32 to vector<8x8xf32>
    %66 = vector.broadcast %cst_32 : f32 to vector<8x8xf32>
    %67 = arith.select %64, %65, %66 : vector<8x8xi1>, vector<8x8xf32>
    %68 = vector.shape_cast %67 : vector<8x8xf32> to vector<1x8x8xf32>
    %69 = vector.broadcast %68 : vector<1x8x8xf32> to vector<8x8x8xf32>
    %70 = arith.addf %61, %69 : vector<8x8x8xf32>
    %cst_33 = arith.constant dense<0xFF800000> : vector<8x8xf32>
    %71 = vector.multi_reduction <maximumf>, %70, %cst_33 [2] : vector<8x8x8xf32> to vector<8x8xf32>
    %72 = vector.shape_cast %71 : vector<8x8xf32> to vector<8x8x1xf32>
    %73 = vector.broadcast %72 : vector<8x8x1xf32> to vector<8x8x8xf32>
    %74 = arith.subf %70, %73 : vector<8x8x8xf32>
    %75 = math.exp %74 : vector<8x8x8xf32>
    %cst_34 = arith.constant dense<0.000000e+00> : vector<8x8xf32>
    %76 = vector.multi_reduction <add>, %75, %cst_34 [2] : vector<8x8x8xf32> to vector<8x8xf32>
    %77 = vector.shape_cast %76 : vector<8x8xf32> to vector<8x8x1xf32>
    %78 = tpu.reciprocal %77 {approx = true} : vector<8x8x1xf32> -> vector<8x8x1xf32>
    %79 = vector.broadcast %78 : vector<8x8x1xf32> to vector<8x8x8xf32>
    %80 = arith.mulf %75, %79 : vector<8x8x8xf32>
    %81 = arith.truncf %80 : vector<8x8x8xf32> to vector<8x8x8xbf16>
    "tpu.trace_start"() <{level = 10 : i32, message = "zqk,zkd->zqd"}> : () -> ()
    %cst_35 = arith.constant dense<0.000000e+00> : vector<8x8x8xf32>
    %82 = tpu.matmul %81, %60, %cst_35 {dimension_numbers = #tpu.dot_dimension_numbers<[2], [1], [1], [2], [0, 0, 0, 1, 1, 2], [0], [0]>} : vector<8x8x8xbf16>, vector<8x8x8xbf16>, vector<8x8x8xf32> -> vector<8x8x8xf32>
    "tpu.trace_stop"() : () -> ()
    %83 = vector.extract_strided_slice %82 {offsets = [0, 0, 0], sizes = [2, 8, 8], strides = [1, 1, 1]} : vector<8x8x8xf32> to vector<2x8x8xf32>
    %84 = vector.shape_cast %83 : vector<2x8x8xf32> to vector<16x8xf32>
    %85 = vector.extract_strided_slice %82 {offsets = [2, 0, 0], sizes = [2, 8, 8], strides = [1, 1, 1]} : vector<8x8x8xf32> to vector<2x8x8xf32>
    %86 = vector.shape_cast %85 : vector<2x8x8xf32> to vector<16x8xf32>
    %87 = vector.extract_strided_slice %82 {offsets = [4, 0, 0], sizes = [2, 8, 8], strides = [1, 1, 1]} : vector<8x8x8xf32> to vector<2x8x8xf32>
    %88 = vector.shape_cast %87 : vector<2x8x8xf32> to vector<16x8xf32>
    %89 = vector.extract_strided_slice %82 {offsets = [6, 0, 0], sizes = [2, 8, 8], strides = [1, 1, 1]} : vector<8x8x8xf32> to vector<2x8x8xf32>
    %90 = vector.shape_cast %89 : vector<2x8x8xf32> to vector<16x8xf32>
    %91 = tpu.concatenate %84, %86, %88, %90 in 1 : vector<16x8xf32>, vector<16x8xf32>, vector<16x8xf32>, vector<16x8xf32> -> vector<16x32xf32>
    %c0_36 = arith.constant 0 : index
    %c0_37 = arith.constant 0 : index
    %c0_38 = arith.constant 0 : index
    %92 = vector.load %arg6[%c0_36, %c0_37, %c0_38] : memref<1x32x32xbf16, #tpu.memory_space<vmem>>, vector<1x32x32xbf16>
    %93 = vector.shape_cast %92 : vector<1x32x32xbf16> to vector<32x32xbf16>
    %94 = arith.truncf %91 : vector<16x32xf32> to vector<16x32xbf16>
    %cst_39 = arith.constant dense<0.000000e+00> : vector<16x32xf32>
    %95 = tpu.matmul %94, %93, %cst_39 {dimension_numbers = #tpu.dot_dimension_numbers<[1], [0], [0], [1], [0, 0, 1, 1], [], []>} : vector<16x32xbf16>, vector<32x32xbf16>, vector<16x32xf32> -> vector<16x32xf32>
    %96 = vector.broadcast %6 : vector<1x32xf32> to vector<16x32xf32>
    %97 = arith.addf %95, %96 : vector<16x32xf32>
    %98 = arith.addf %19, %97 : vector<16x32xf32>
    %cst_40 = arith.constant dense<0.000000e+00> : vector<16xf32>
    %99 = vector.multi_reduction <add>, %98, %cst_40 [1] : vector<16x32xf32> to vector<16xf32>
    %100 = vector.shape_cast %99 : vector<16xf32> to vector<16x1xf32>
    %cst_41 = arith.constant 3.200000e+01 : f32
    %101 = vector.broadcast %cst_41 : f32 to vector<16x1xf32>
    %102 = arith.divf %100, %101 : vector<16x1xf32>
    %103 = vector.broadcast %102 : vector<16x1xf32> to vector<16x32xf32>
    %104 = arith.subf %98, %103 : vector<16x32xf32>
    %105 = arith.mulf %104, %104 : vector<16x32xf32>
    %cst_42 = arith.constant dense<0.000000e+00> : vector<16xf32>
    %106 = vector.multi_reduction <add>, %105, %cst_42 [1] : vector<16x32xf32> to vector<16xf32>
    %107 = vector.shape_cast %106 : vector<16xf32> to vector<16x1xf32>
    %cst_43 = arith.constant 3.200000e+01 : f32
    %108 = vector.broadcast %cst_43 : f32 to vector<16x1xf32>
    %109 = arith.divf %107, %108 : vector<16x1xf32>
    %110 = vector.broadcast %102 : vector<16x1xf32> to vector<16x32xf32>
    %111 = arith.subf %98, %110 : vector<16x32xf32>
    %cst_44 = arith.constant 9.99999974E-6 : f32
    %112 = vector.broadcast %cst_44 : f32 to vector<16x1xf32>
    %113 = arith.addf %109, %112 : vector<16x1xf32>
    %114 = math.rsqrt %113 : vector<16x1xf32>
    %115 = vector.broadcast %114 : vector<16x1xf32> to vector<16x32xf32>
    %116 = arith.mulf %111, %115 : vector<16x32xf32>
    %117 = vector.broadcast %12 : vector<1x32xf32> to vector<16x32xf32>
    %118 = arith.mulf %116, %117 : vector<16x32xf32>
    %119 = vector.broadcast %14 : vector<1x32xf32> to vector<16x32xf32>
    %120 = arith.addf %118, %119 : vector<16x32xf32>
    %c0_45 = arith.constant 0 : index
    %c0_46 = arith.constant 0 : index
    %c0_47 = arith.constant 0 : index
    %121 = vector.load %arg8[%c0_45, %c0_46, %c0_47] : memref<1x32x64xbf16, #tpu.memory_space<vmem>>, vector<1x32x64xbf16>
    %122 = vector.shape_cast %121 : vector<1x32x64xbf16> to vector<32x64xbf16>
    %123 = arith.truncf %120 : vector<16x32xf32> to vector<16x32xbf16>
    %cst_48 = arith.constant dense<0.000000e+00> : vector<16x64xf32>
    %124 = tpu.matmul %123, %122, %cst_48 {dimension_numbers = #tpu.dot_dimension_numbers<[1], [0], [0], [1], [0, 0, 1, 1], [], []>} : vector<16x32xbf16>, vector<32x64xbf16>, vector<16x64xf32> -> vector<16x64xf32>
    %125 = vector.broadcast %8 : vector<1x64xf32> to vector<16x64xf32>
    %126 = arith.addf %124, %125 : vector<16x64xf32>
    %cst_49 = arith.constant 0.000000e+00 : f32
    %127 = vector.broadcast %cst_49 : f32 to vector<16x64xf32>
    %128 = arith.maximumf %126, %127 : vector<16x64xf32>
    %c0_50 = arith.constant 0 : index
    %c0_51 = arith.constant 0 : index
    %c0_52 = arith.constant 0 : index
    %129 = vector.load %arg10[%c0_50, %c0_51, %c0_52] : memref<1x64x32xbf16, #tpu.memory_space<vmem>>, vector<1x64x32xbf16>
    %130 = vector.shape_cast %129 : vector<1x64x32xbf16> to vector<64x32xbf16>
    %131 = arith.truncf %128 : vector<16x64xf32> to vector<16x64xbf16>
    %cst_53 = arith.constant dense<0.000000e+00> : vector<16x32xf32>
    %132 = tpu.matmul %131, %130, %cst_53 {dimension_numbers = #tpu.dot_dimension_numbers<[1], [0], [0], [1], [0, 0, 1, 1], [], []>} : vector<16x64xbf16>, vector<64x32xbf16>, vector<16x32xf32> -> vector<16x32xf32>
    %133 = vector.broadcast %10 : vector<1x32xf32> to vector<16x32xf32>
    %134 = arith.addf %132, %133 : vector<16x32xf32>
    %135 = arith.addf %120, %134 : vector<16x32xf32>
    %cst_54 = arith.constant dense<0.000000e+00> : vector<16xf32>
    %136 = vector.multi_reduction <add>, %135, %cst_54 [1] : vector<16x32xf32> to vector<16xf32>
    %137 = vector.shape_cast %136 : vector<16xf32> to vector<16x1xf32>
    %cst_55 = arith.constant 3.200000e+01 : f32
    %138 = vector.broadcast %cst_55 : f32 to vector<16x1xf32>
    %139 = arith.divf %137, %138 : vector<16x1xf32>
    %140 = vector.broadcast %139 : vector<16x1xf32> to vector<16x32xf32>
    %141 = arith.subf %135, %140 : vector<16x32xf32>
    %142 = arith.mulf %141, %141 : vector<16x32xf32>
    %cst_56 = arith.constant dense<0.000000e+00> : vector<16xf32>
    %143 = vector.multi_reduction <add>, %142, %cst_56 [1] : vector<16x32xf32> to vector<16xf32>
    %144 = vector.shape_cast %143 : vector<16xf32> to vector<16x1xf32>
    %cst_57 = arith.constant 3.200000e+01 : f32
    %145 = vector.broadcast %cst_57 : f32 to vector<16x1xf32>
    %146 = arith.divf %144, %145 : vector<16x1xf32>
    %147 = vector.broadcast %139 : vector<16x1xf32> to vector<16x32xf32>
    %148 = arith.subf %135, %147 : vector<16x32xf32>
    %cst_58 = arith.constant 9.99999974E-6 : f32
    %149 = vector.broadcast %cst_58 : f32 to vector<16x1xf32>
    %150 = arith.addf %146, %149 : vector<16x1xf32>
    %151 = math.rsqrt %150 : vector<16x1xf32>
    %152 = vector.broadcast %151 : vector<16x1xf32> to vector<16x32xf32>
    %153 = arith.mulf %148, %152 : vector<16x32xf32>
    %154 = vector.broadcast %16 : vector<1x32xf32> to vector<16x32xf32>
    %155 = arith.mulf %153, %154 : vector<16x32xf32>
    %156 = vector.broadcast %18 : vector<1x32xf32> to vector<16x32xf32>
    %157 = arith.addf %155, %156 : vector<16x32xf32>
    %c0_59 = arith.constant 0 : index
    %c0_60 = arith.constant 0 : index
    %158 = vector.load %arg19[%c0_59, %c0_60] : memref<16x32xf32, #tpu.memory_space<vmem>>, vector<16x32xf32>
    tpu.vector_store %arg19[%c0_59, %c0_60], %157 {strides = array<i32>} : memref<16x32xf32, #tpu.memory_space<vmem>>, vector<16x32xf32>,
    %c1_i32 = arith.constant 1 : i32
    %159 = arith.cmpi eq, %arg1, %c1_i32 : i32
    %160 = arith.extui %159 : i1 to i32
    %c0_i32_61 = arith.constant 0 : i32
    %161 = arith.cmpi ne, %160, %c0_i32_61 : i32
    scf.if %161 {
      %c0_62 = arith.constant 0 : index
      %c0_63 = arith.constant 0 : index
      %162 = vector.load %arg16[%c0_62, %c0_63] : memref<1x32xf32, #tpu.memory_space<vmem>>, vector<1x32xf32>
      %c0_64 = arith.constant 0 : index
      %c0_65 = arith.constant 0 : index
      %163 = vector.load %arg17[%c0_64, %c0_65] : memref<1x32xf32, #tpu.memory_space<vmem>>, vector<1x32xf32>
      %cst_66 = arith.constant dense<0.000000e+00> : vector<16xf32>
      %164 = vector.multi_reduction <add>, %157, %cst_66 [1] : vector<16x32xf32> to vector<16xf32>
      %165 = vector.shape_cast %164 : vector<16xf32> to vector<16x1xf32>
      %cst_67 = arith.constant 3.200000e+01 : f32
      %166 = vector.broadcast %cst_67 : f32 to vector<16x1xf32>
      %167 = arith.divf %165, %166 : vector<16x1xf32>
      %168 = vector.broadcast %167 : vector<16x1xf32> to vector<16x32xf32>
      %169 = arith.subf %157, %168 : vector<16x32xf32>
      %170 = arith.mulf %169, %169 : vector<16x32xf32>
      %cst_68 = arith.constant dense<0.000000e+00> : vector<16xf32>
      %171 = vector.multi_reduction <add>, %170, %cst_68 [1] : vector<16x32xf32> to vector<16xf32>
      %172 = vector.shape_cast %171 : vector<16xf32> to vector<16x1xf32>
      %cst_69 = arith.constant 3.200000e+01 : f32
      %173 = vector.broadcast %cst_69 : f32 to vector<16x1xf32>
      %174 = arith.divf %172, %173 : vector<16x1xf32>
      %175 = vector.broadcast %167 : vector<16x1xf32> to vector<16x32xf32>
      %176 = arith.subf %157, %175 : vector<16x32xf32>
      %cst_70 = arith.constant 9.99999974E-6 : f32
      %177 = vector.broadcast %cst_70 : f32 to vector<16x1xf32>
      %178 = arith.addf %174, %177 : vector<16x1xf32>
      %179 = math.rsqrt %178 : vector<16x1xf32>
      %180 = vector.broadcast %179 : vector<16x1xf32> to vector<16x32xf32>
      %181 = arith.mulf %176, %180 : vector<16x32xf32>
      %182 = vector.broadcast %162 : vector<1x32xf32> to vector<16x32xf32>
      %183 = arith.mulf %181, %182 : vector<16x32xf32>
      %184 = vector.broadcast %163 : vector<1x32xf32> to vector<16x32xf32>
      %185 = arith.addf %183, %184 : vector<16x32xf32>
      %186 = vector.extract_strided_slice %185 {offsets = [0, 0], sizes = [8, 32], strides = [1, 1]} : vector<16x32xf32> to vector<8x32xf32>
      %c0_71 = arith.constant 0 : index
      %c0_72 = arith.constant 0 : index
      %c0_73 = arith.constant 0 : index
      %187 = vector.load %arg18[%c0_71, %c0_72, %c0_73] : memref<8x2x32xf32, #tpu.memory_space<vmem>>, vector<8x1x32xf32>
      %188 = vector.shape_cast %187 : vector<8x1x32xf32> to vector<8x32xf32>
      %189 = vector.shape_cast %186 : vector<8x32xf32> to vector<8x1x32xf32>
      tpu.vector_store %arg18[%c0_71, %c0_72, %c0_73], %189 {strides = array<i32>} : memref<8x2x32xf32, #tpu.memory_space<vmem>>, vector<8x1x32xf32>,
      %190 = vector.extract_strided_slice %185 {offsets = [8, 0], sizes = [8, 32], strides = [1, 1]} : vector<16x32xf32> to vector<8x32xf32>
      %c0_74 = arith.constant 0 : index
      %c1 = arith.constant 1 : index
      %c0_75 = arith.constant 0 : index
      %191 = vector.load %arg18[%c0_74, %c1, %c0_75] : memref<8x2x32xf32, #tpu.memory_space<vmem>>, vector<8x1x32xf32>
      %192 = vector.shape_cast %191 : vector<8x1x32xf32> to vector<8x32xf32>
      %193 = vector.shape_cast %190 : vector<8x32xf32> to vector<8x1x32xf32>
      tpu.vector_store %arg18[%c0_74, %c1, %c0_75], %193 {strides = array<i32>} : memref<8x2x32xf32, #tpu.memory_space<vmem>>, vector<8x1x32xf32>,
    } else {
    }
    return
  }
  func.func @transform_0(%arg0: i32, %arg1: i32) -> (i32, i32, i32) {
    %c0_i32 = arith.constant 0 : i32
    %c0_i32_0 = arith.constant 0 : i32
    %c0_i32_1 = arith.constant 0 : i32
    return %arg0, %c0_i32, %c0_i32_0 : i32, i32, i32
  }
  func.func @transform_1(%arg0: i32, %arg1: i32) -> (i32, i32) {
    %c0_i32 = arith.constant 0 : i32
    %c0_i32_0 = arith.constant 0 : i32
    %c0_i32_1 = arith.constant 0 : i32
    return %c0_i32, %c0_i32_0 : i32, i32
  }
  func.func @transform_2(%arg0: i32, %arg1: i32) -> (i32, i32, i32) {
    %c0_i32 = arith.constant 0 : i32
    %c0_i32_0 = arith.constant 0 : i32
    %c0_i32_1 = arith.constant 0 : i32
    return %arg1, %c0_i32, %c0_i32_0 : i32, i32, i32
  }
  func.func @transform_3(%arg0: i32, %arg1: i32) -> (i32, i32, i32) {
    %c0_i32 = arith.constant 0 : i32
    %c0_i32_0 = arith.constant 0 : i32
    %c0_i32_1 = arith.constant 0 : i32
    return %arg1, %c0_i32, %c0_i32_0 : i32, i32, i32
  }
  func.func @transform_4(%arg0: i32, %arg1: i32) -> (i32, i32, i32) {
    %c0_i32 = arith.constant 0 : i32
    %c0_i32_0 = arith.constant 0 : i32
    %c0_i32_1 = arith.constant 0 : i32
    return %arg1, %c0_i32, %c0_i32_0 : i32, i32, i32
  }
  func.func @transform_5(%arg0: i32, %arg1: i32) -> (i32, i32, i32) {
    %c0_i32 = arith.constant 0 : i32
    %c0_i32_0 = arith.constant 0 : i32
    %c0_i32_1 = arith.constant 0 : i32
    return %arg1, %c0_i32, %c0_i32_0 : i32, i32, i32
  }
  func.func @transform_6(%arg0: i32, %arg1: i32) -> (i32, i32, i32) {
    %c0_i32 = arith.constant 0 : i32
    %c0_i32_0 = arith.constant 0 : i32
    %c0_i32_1 = arith.constant 0 : i32
    return %arg1, %c0_i32, %c0_i32_0 : i32, i32, i32
  }
  func.func @transform_7(%arg0: i32, %arg1: i32) -> (i32, i32, i32) {
    %c0_i32 = arith.constant 0 : i32
    %c0_i32_0 = arith.constant 0 : i32
    %c0_i32_1 = arith.constant 0 : i32
    return %arg1, %c0_i32, %c0_i32_0 : i32, i32, i32
  }
  func.func @transform_8(%arg0: i32, %arg1: i32) -> (i32, i32, i32) {
    %c0_i32 = arith.constant 0 : i32
    %c0_i32_0 = arith.constant 0 : i32
    %c0_i32_1 = arith.constant 0 : i32
    return %arg1, %c0_i32, %c0_i32_0 : i32, i32, i32
  }
  func.func @transform_9(%arg0: i32, %arg1: i32) -> (i32, i32, i32) {
    %c0_i32 = arith.constant 0 : i32
    %c0_i32_0 = arith.constant 0 : i32
    %c0_i32_1 = arith.constant 0 : i32
    return %arg1, %c0_i32, %c0_i32_0 : i32, i32, i32
  }
  func.func @transform_10(%arg0: i32, %arg1: i32) -> (i32, i32, i32) {
    %c0_i32 = arith.constant 0 : i32
    %c0_i32_0 = arith.constant 0 : i32
    %c0_i32_1 = arith.constant 0 : i32
    return %arg1, %c0_i32, %c0_i32_0 : i32, i32, i32
  }
  func.func @transform_11(%arg0: i32, %arg1: i32) -> (i32, i32, i32) {
    %c0_i32 = arith.constant 0 : i32
    %c0_i32_0 = arith.constant 0 : i32
    %c0_i32_1 = arith.constant 0 : i32
    return %arg1, %c0_i32, %c0_i32_0 : i32, i32, i32
  }
  func.func @transform_12(%arg0: i32, %arg1: i32) -> (i32, i32, i32) {
    %c0_i32 = arith.constant 0 : i32
    %c0_i32_0 = arith.constant 0 : i32
    %c0_i32_1 = arith.constant 0 : i32
    return %arg1, %c0_i32, %c0_i32_0 : i32, i32, i32
  }
  func.func @transform_13(%arg0: i32, %arg1: i32) -> (i32, i32, i32) {
    %c0_i32 = arith.constant 0 : i32
    %c0_i32_0 = arith.constant 0 : i32
    %c0_i32_1 = arith.constant 0 : i32
    return %arg1, %c0_i32, %c0_i32_0 : i32, i32, i32
  }
  func.func @transform_14(%arg0: i32, %arg1: i32) -> (i32, i32) {
    %c0_i32 = arith.constant 0 : i32
    %c0_i32_0 = arith.constant 0 : i32
    %c0_i32_1 = arith.constant 0 : i32
    return %c0_i32, %c0_i32_0 : i32, i32
  }
  func.func @transform_15(%arg0: i32, %arg1: i32) -> (i32, i32) {
    %c0_i32 = arith.constant 0 : i32
    %c0_i32_0 = arith.constant 0 : i32
    %c0_i32_1 = arith.constant 0 : i32
    return %c0_i32, %c0_i32_0 : i32, i32
  }
  func.func @transform_16(%arg0: i32, %arg1: i32) -> (i32, i32, i32) {
    %c0_i32 = arith.constant 0 : i32
    %c0_i32_0 = arith.constant 0 : i32
    %c0_i32_1 = arith.constant 0 : i32
    return %c0_i32, %arg0, %c0_i32_0 : i32, i32, i32
  }
}

</mosaic_0001>

<bundles_post_ra>
// kernel: tpu_custom_call.1
= control target key start
LH: loop header
LB: loop body
LE: loop exit
PB: predicated region body
PF: predicated region fallthrough
CT: control target
= control target key end

     0   :  { %s3563_s0 = inlined_call_operand.hbm [shape: f32[2,8,32], index: 0, kind: input, shape index: {}]   ;;  %s3564_s1 = inlined_call_operand.hbm [shape: f32[8,32], index: 1, kind: input, shape index: {}]   ;;  %s3565_s2 = inlined_call_operand.vmem [shape: bf16[2,32,96], index: 2, kind: input, shape index: {}]   ;;  %s3566_s3 = inlined_call_operand.vmem [shape: f32[2,1,96], index: 3, kind: input, shape index: {}]   ;;  %s3567_s4 = inlined_call_operand.vmem [shape: bf16[2,32,32], index: 4, kind: input, shape index: {}]   ;;  %s3568_s5 = inlined_call_operand.vmem [shape: f32[2,1,32], index: 5, kind: input, shape index: {}]   ;;  %s3569_s6 = inlined_call_operand.vmem [shape: bf16[2,32,64], index: 6, kind: input, shape index: {}]   ;;  %s3570_s7 = inlined_call_operand.vmem [shape: f32[2,1,64], index: 7, kind: input, shape index: {}]   ;;  %s3571_s8 = inlined_call_operand.vmem [shape: bf16[2,64,32], index: 8, kind: input, shape index: {}]   ;;  %s3572_s9 = inlined_call_operand.vmem [shape: f32[2,1,32], index: 9, kind: input, shape index: {}]   ;;  %s3573_s10 = inlined_call_operand.vmem [shape: f32[2,1,32], index: 10, kind: input, shape index: {}]   ;;  %s3574_s11 = inlined_call_operand.vmem [shape: f32[2,1,32], index: 11, kind: input, shape index: {}]   ;;  %s3575_s12 = inlined_call_operand.vmem [shape: f32[2,1,32], index: 12, kind: input, shape index: {}]   ;;  %s3576_s13 = inlined_call_operand.vmem [shape: f32[2,1,32], index: 13, kind: input, shape index: {}]   ;;  %s3577_s14 = inlined_call_operand.vmem [shape: f32[1,32], index: 14, kind: input, shape index: {}]   ;;  %s3578_s15 = inlined_call_operand.vmem [shape: f32[1,32], index: 15, kind: input, shape index: {}]   ;;  %s3579_s16 = inlined_call_operand.hbm [shape: f32[8,2,32], index: 16, kind: output, shape index: {}]  }
   0x1   :  { %3583 = sst [smem:[#allocation15_spill]] %s3563_s0 }
   0x2   :  { %3584 = sst [smem:[#allocation16_spill]] %s3564_s1 }
   0x3   :  { %3585 = sst [smem:[#allocation17_spill]] %s3565_s2 }
   0x4   :  { %3586 = sst [smem:[#allocation18_spill]] %s3567_s4 }
   0x5   :  { %3587 = sst [smem:[#allocation19_spill]] %s3569_s6 }
   0x6   :  { %3588 = sst [smem:[#allocation20_spill]] %s3577_s14 }
   0x7   :  { %3589 = sst [smem:[#allocation21_spill]] %s3578_s15 }
   0x8   :  { %3590 = sst [smem:[#allocation22_spill]] %s3579_s16 }
   0x9   :  { %21 = vsyncpa [#allocation4], 0 }
   0xa   :  { %22 = vsyncpa [#allocation7], 0 }
   0xb   :  { %23 = vsyncpa [#allocation5], 0  ;;  %s3107_s21 = smov 0   ;;  %s3109_s22 = smov 0  }
   0xc   :  { %s3111_s23 = smov 0  }
   0xd LB: > { %3591 = sst [smem:[#allocation12_spill]] %s2997_s22  ;;  %s3580_s24 = sadd.s32 4294967295, %s3001_s23   ;;  %s3001_s23 = sphi %s3111_s23, %s29_s23   ;;  %s2997_s22 = sphi %s3109_s22, %s3613_s22   ;;  %s2993_s21 = sphi %s3107_s21, %s3612_s21  }
   0xe   : > { %3592 = sst [smem:[#allocation13_spill]] %s3001_s23  ;;  %s38_s25 = sadd.s32 1, %s2997_s22 }
   0xf   : > { %p39_p0 = scmp.ge.s32.totalorder %s38_s25, 2  ;;  %p2481_p1 = scmp.ge.s32.totalorder %s3001_s23, 1 }
  0x10   : > { %p473_p2 = scmp.lt.s32.totalorder %s3001_s23, 3  ;;  %p3134_p4 = scmp.eq.s32.totalorder %s3580_s24, 0 }
  0x11   : > { %s3615_s25 = smov (%p39_p0, %s38_s25), 0  ;;  %s3003_s28 = smov [#allocation3]  }
  0x12   : > { %3593 = sst [smem:[#allocation14_spill]] %s3615_s25  ;;  %p3128_p3 = pnand %p2481_p1, %p473_p2 }
  0x13   : > { %s488_s29 = sshll.u32 %s3003_s28, 4  ;;  %s3004_s0 = smov [#allocation6]   ;;  %s489_s29 = int_to_ptr.vmem [resolvable:$true] %s488_s29 }
  0x14   : > { %p2736_p5 = pneg %p3128_p3  ;;  %s502_s17 = sshll.u32 %s3004_s0, 4  ;;  %s503_s17 = int_to_ptr.vmem [resolvable:$true] %s502_s17 }
  0x15   : > { %s2902_s18 = scalar_lea.vmem %s489_s29, 256  ;;  %p2910_p11 = scmp.lt.s32.totalorder %s489_s29, %s489_s29 }
  0x16   : > { %p3142_p6 = pnand %p3134_p4, %p2736_p5  ;;  %p2903_p8 = scmp.ne.s32.totalorder %s489_s29, %s2902_s18 }
  0x17   : > { %p2911_p12 = scmp.lt.s32.totalorder %s2902_s18, %s2902_s18 }
  0x18   : > { %p2893_p7 = pneg %p3142_p6 }
  0x19   : > { %p2912_p13 = por %p2911_p12, %p2910_p11 }
  0x1a   : > { %p2905_p9 = pnand %p2903_p8, %p2893_p7 }
  0x1c   : > { %p2906_p10 = pneg %p2905_p9 }
  0x1e   : > { %p2913_p0 = pnand %p2912_p13, %p2906_p10 }
  0x20   : > { %2916 = shalt.err (!%p2913_p0)
}
  0x21   : > { %s3005_s19 = smov 128   ;;  %s3006_s20 = smov 8  }
  0x22   : > { %s3597_s24 = sld [smem:[#allocation15_spill]]  ;;  %s2928_s25 = scalar_lea.vmem %s503_s17, 128 }
  0x23   : > { %p2929_p1 = scmp.ne.s32.totalorder %s503_s17, %s2928_s25  ;;  %p2936_p8 = scmp.lt.s32.totalorder %s503_s17, %s503_s17 }
  0x24   : > { %p2937_p9 = scmp.lt.s32.totalorder %s2928_s25, %s2928_s25 }
  0x25   : > { %p2931_p2 = pnand %p2929_p1, %p2893_p7 }
  0x26   : > { %p2938_p11 = por %p2937_p9, %p2936_p8 }
  0x27   : > { %p2932_p5 = pneg %p2931_p2 }
  0x28   : > { %2739 = dma.hbm_to_vmem [thread:$0]  (!%p3142_p6), %s3597_s24, 256, %s489_s29, [#allocation4], %s3005_s19, %s3005_s19, %s3006_s20  }
  0x29   : > { %p2939_p10 = pnand %p2938_p11, %p2932_p5 }
  0x2b   : > { %2942 = shalt.err (!%p2939_p10)
}
  0x2c   : > { %s3598_s1 = sld [smem:[#allocation16_spill]] }
  0x2e   : > { %601 = sbr.rel (%p3128_p3) target bundleno = 2986 (0xbaa), region = 84 }
  0x32   : > { %2742 = dma.hbm_to_vmem [thread:$0]  (!%p3142_p6), %s3598_s1, 128, %s503_s17, [#allocation7]  }
  0x33   : > { %2980 = dma.done.wait (%p3134_p4), [#allocation4], 256  }
  0x34   : > { %2982 = vsyncadd (%p3134_p4), [#allocation4], 4294967040 }
  0x35   : > { %2984 = dma.done.wait (%p3134_p4), [#allocation7], 128  }
  0x36   : > { %2986 = vsyncadd (%p3134_p4), [#allocation7], 4294967168  ;;  %p690_p7 = scmp.lt.s32.totalorder %s2993_s21, 1  ;;  %s3599_s2 = sld [smem:[#allocation17_spill]] }
  0x37   : > { %s3600_s4 = sld [smem:[#allocation18_spill]]  ;;  %p2496_p3 = scmp.ne.s32.totalorder %s2993_s21, 0 }
  0x38   : > { %s3176_s22 = scalar_select %p690_p7, %s2993_s21, 1 }
  0x39   : > { %s3601_s6 = sld [smem:[#allocation19_spill]] }
  0x3a   : > { %s2542_s24 = sshll.u32 %s3176_s22, 4  ;;  %s2545_s29 = sshll.u32 %s3176_s22, 5 }
  0x3b   : > { %s3208_s19 = scalar_lea.vmem %s3571_s8, %s2545_s29  ;;  %s721_s0 = scalar_lea.vmem %s3572_s9, %s3176_s22 }
  0x3c   : > { %s694_s17 = scalar_lea.vmem %s3599_s2, %s2542_s24  ;;  %s724_s16 = scalar_lea.vmem %s3573_s10, %s3176_s22 }
  0x3d   : > { %s3189_s28 = scalar_lea.vmem %s3600_s4, %s2542_s24  ;;  %s730_s27 = scalar_lea.vmem %s3575_s12, %s3176_s22 }
  0x3e   : > { %s733_s29 = scalar_lea.vmem %s3576_s13, %s3176_s22  ;;  %738 = sbr.rel (%p2496_p3) target bundleno = 71 (0x47), region = 96 }
  0x3f   : > { %s3198_s15 = scalar_lea.vmem %s3601_s6, %s2542_s24  ;;  %s727_s6 = scalar_lea.vmem %s3574_s11, %s3176_s22 }
  0x43   : > { %v739_v0 = vld [vmem:[#allocation3] sm:$0xff]  ;;  %v741_v1 = vld [vmem:[#allocation6] sm:$0xff]  ;;  %vm744_vm0 = vcmask 261120   ;;  %v740_v2 = vld [vmem:[#allocation3 + $0x8] sm:$0xff] }
  0x44   : > { %v742_v3 = vadd.f32 %v741_v1, %v739_v0  ;;  %v743_v4 = vadd.f32 %v741_v1, %v740_v2 }
  0x46   : > { %745 = vst.msk [vmem:[#allocation2] sm:$0xff] %vm744_vm0, %v742_v3  ;;  %746 = vst.msk [vmem:[#allocation2 + $0x8] sm:$0xff] %vm744_vm0, %v743_v4 }
  0x47 PF: > { %v2837_v5 = vld [vmem:[%s694_s17 + $0x8] sm:$0xff]   ;;  %v3007_v6 = vmov 0.0   ;;  %v2838_v7 = vld [vmem:[%s694_s17] sm:$0xff]   ;;  %vm3008_vm1 = vmmov 0   ;;  %vm780_vm2 = vcmask 261120   ;;  %s3602_s14 = scalar_lea.vmem %s3566_s3, %s3176_s22  ;;  %s3009_s17 = smov 104  }
  0x48   : > { %2592 = vmatprep.subr.bf16.mxu0 %v3007_v6  ;;  %2600 = vmatprep.subr.bf16.mxu1 %v3007_v6  ;;  %v2497_v12 = vld [vmem:[%s3602_s14] ss:$0 sm:$0xff]  ;;  %s3010_s30 = smov 120   ;;  %s3011_s20 = smov 112   ;;  %vm892_vm3 = vcmask 64512   ;;  %vm1383_vm4 = vcmask 1043456  }
  0x49   : > { %2593 = vmatpush3.bf16.msra.mxu0 %v2837_v5  ;;  %2596 = vmatprep.mubr.msk.bf16.mxu0 %vm3008_vm1, %v3007_v6  ;;  %s3012_s18 = smov 96   ;;  %s3013_s23 = smov 64   ;;  %vm1789_vm6 = vcmask 130048   ;;  %vm1792_vm7 = vcmask 195584   ;;  %vm2015_vm8 = vcmask 523264  }
  0x4a   : > { %2594 = vmatprep.subr.bf16.mxu0 %v3007_v6  ;;  %2602 = vmatprep.mubr.msk.bf16.mxu1 %vm3008_vm1, %v3007_v6  ;;  %s3015_s24 = smov 8   ;;  %s3016_s25 = smov 16  }
  0x4b   : > { %s3603_s1 = scalar_lea.vmem %s3568_s5, %s3176_s22  ;;  %p2535_p4 = scmp.ne.s32.totalorder %s2993_s21, 1 }
  0x4d   : > { %v3235_v8 = vld [vmem:[#allocation2] sm:$0xff]  ;;  %v3237_v9 = vld [vmem:[#allocation2 + $0x8] sm:$0xff]  ;;  %2595 = vmatpush3.bf16.msra.mxu0 %v2838_v7 }
  0x4e   : > { %v761_v10 = vpack.c.bf16 %v3237_v9, %v3235_v8  ;;  %2606 = vmatprep.subr.bf16.mxu0 %v3007_v6 }
  0x50   : > { %2597 = vmatmul.mubr.msk.bf16.vlgmr.msra.gmra.mxu0 %vm780_vm2, %v761_v10 }
  0x51   : > { %2608 = vmatprep.mubr.msk.bf16.mxu0 %vm3008_vm1, %v3007_v6 }
 0x110   : > { %v818_v11 = vpop.f32.mrf.mxu0 }
 0x111   : > { %v819_v14 = vadd.f32 %v2497_v12, %v818_v11 }
 0x112   : > { %v2598_v13 = vpop.f32.mrf.mxu0 }
 0x113   : > { %v825_v19 = vmul.f32 0.35355338, %v819_v14  ;;  %v875_v22 = vpack.c.bf16 %v819_v14, %v819_v14  ;;  %v883_v13 = vlaneseq }
 0x114   : > { %v821_v15 = vpop.f32.mrf.mxu0 }
 0x115   : > { %v822_v16 = vadd.f32 %v2497_v12, %v821_v15  ;;  %v847_v41 = vpack.c.bf16 %v825_v19, %v825_v19  ;;  %v886_v15 = vand.u32 127, %v883_v13 }
 0x116   : > { %v2599_v17 = vpop.f32.mrf.mxu0 }
 0x117   : > { %v2802_v18 = vpack.i.bf16 %v822_v16, %v819_v14  ;;  %v826_v20 = vmul.f32 0.35355338, %v822_v16  ;;  %v3257_v23 = vpack.c.bf16 %v822_v16, %v822_v16  ;;  %v3331_v14 = vshrl.u32 %v883_v13, 7 }
 0x118   : > { %v3014_v16 = vmov -1e+09  }
 0x119   : > { %2803 = vrot.lane.b32.xlu1 %v2802_v18, %s3009_s17  ;;  %2793 = vrot.lane.b32.xlu0 %v2802_v18, %s3010_s30  ;;  %v2807_v21 = vpack.i.bf16 %v826_v20, %v825_v19  ;;  %v848_v43 = vpack.c.bf16 %v826_v20, %v826_v20  ;;  %vm887_vm5 = vcmp.ge.s32.totalorder %v3331_v14, %v886_v15 }
 0x11a   : > { %v888_v17 = vsel %vm887_vm5, 0.0, %v3014_v16 }
 0x11d   : > { %2798 = vrot.lane.b32.xlu0 %v2802_v18, %s3011_s20  ;;  %890 = vrot.lane.b32.xlu1 %v875_v22, %s3012_s18 }
 0x121   : > { %940 = vrot.lane.b32.xlu0 %v3257_v23, %s3012_s18 }
 0x18b   : > { %v2804_v24 = vpop.permute.xlu1 %2803  ;;  %v2794_v25 = vpop.permute.xlu0 %2793 }
 0x18c   : > { %v2796_v26 = vunpack.i.h.bf16 %v2794_v25  ;;  %v2795_v27 = vunpack.i.l.bf16 %v2794_v25  ;;  %v2806_v38 = vunpack.i.h.bf16 %v2804_v24  ;;  %v2805_v40 = vunpack.i.l.bf16 %v2804_v24 }
 0x18e   : > { %v3261_v28 = vpack.c.bf16 %v2796_v26, %v2796_v26  ;;  %v3263_v29 = vpack.c.bf16 %v2795_v27, %v2795_v27  ;;  %v3284_v42 = vpack.c.bf16 %v2806_v38, %v2806_v38  ;;  %v3288_v44 = vpack.c.bf16 %v2805_v40, %v2805_v40 }
 0x18f   : > { %v2799_v30 = vpop.permute.xlu0 %2798  ;;  %v891_v31 = vpop.permute.xlu1 %890 }
 0x190   : > { %v2800_v32 = vunpack.i.l.bf16 %v2799_v30  ;;  %1038 = vrot.lane.b32.xlu0 %v3261_v28, %s3012_s18  ;;  %989 = vrot.lane.b32.xlu1 %v3263_v29, %s3012_s18  ;;  %v897_v33 = vsel %vm892_vm3, %v891_v31, 0  ;;  %v2801_v34 = vunpack.i.h.bf16 %v2799_v30 }
 0x191   : > { %2601 = vmatpush3.bf16.xpose.msra.mxu1 %v897_v33 }
 0x192   : > { %v3270_v35 = vpack.c.bf16 %v2800_v32, %v2800_v32  ;;  %2612 = vmatprep.subr.bf16.mxu1 %v3007_v6  ;;  %v3277_v39 = vpack.c.bf16 %v2801_v34, %v2801_v34 }
 0x193   : > { %v941_v36 = vpop.permute.xlu0 %940 }
 0x194   : > { %v946_v37 = vsel %vm892_vm3, %v941_v36, 0  ;;  %1087 = vrot.lane.b32.xlu0 %v3270_v35, %s3012_s18  ;;  %2808 = vrot.lane.b32.xlu1 %v2807_v21, %s3010_s30 }
 0x195   : > { %2607 = vmatpush3.bf16.xpose.msra.mxu0 %v946_v37 }
 0x196   : > { %2618 = vmatprep.subr.bf16.mxu0 %v3007_v6 }
 0x198   : > { %2813 = vrot.lane.b32.xlu0 %v2807_v21, %s3011_s20  ;;  %1136 = vrot.lane.b32.xlu1 %v3277_v39, %s3012_s18 }
 0x199   : > { %2603 = vmatmul.mubr.msk.bf16.vlgmr.msra.gmra.mxu1 %vm892_vm3, %v847_v41 }
 0x19a   : > { %2614 = vmatprep.mubr.msk.bf16.mxu1 %vm3008_vm1, %v3007_v6 }
 0x19c   : > { %2609 = vmatmul.mubr.msk.bf16.vlgmr.msra.gmra.mxu0 %vm892_vm3, %v848_v43  ;;  %1234 = vrot.lane.b32.xlu0 %v3284_v42, %s3012_s18 }
 0x19d   : > { %1185 = vrot.lane.b32.xlu1 %v3288_v44, %s3012_s18  ;;  %2620 = vmatprep.mubr.msk.bf16.mxu0 %vm3008_vm1, %v3007_v6 }
 0x1a1   : > { %2818 = vrot.lane.b32.xlu1 %v2807_v21, %s3009_s17 }
 0x1a5   : > { %1378 = vrot.lane.b32.xlu1 %v875_v22, %s3013_s23 }
 0x202   : > { %v1039_v45 = vpop.permute.xlu0 %1038  ;;  %v990_v46 = vpop.permute.xlu1 %989 }
 0x203   : > { %v1044_v47 = vsel %vm892_vm3, %v1039_v45, 0  ;;  %v995_v48 = vsel %vm892_vm3, %v990_v46, 0 }
 0x204   : > { %2613 = vmatpush3.bf16.xpose.msra.mxu1 %v995_v48  ;;  %2619 = vmatpush3.bf16.xpose.msra.mxu0 %v1044_v47 }
 0x205   : > { %2624 = vmatprep.subr.bf16.mxu1 %v3007_v6  ;;  %2630 = vmatprep.subr.bf16.mxu0 %v3007_v6 }
 0x206   : > { %v1088_v49 = vpop.permute.xlu0 %1087  ;;  %v2809_v50 = vpop.permute.xlu1 %2808 }
 0x207   : > { %v2811_v51 = vunpack.i.h.bf16 %v2809_v50  ;;  %v2810_v52 = vunpack.i.l.bf16 %v2809_v50  ;;  %v1093_v57 = vsel %vm892_vm3, %v1088_v49, 0 }
 0x209   : > { %v850_v53 = vpack.c.bf16 %v2811_v51, %v2811_v51  ;;  %v849_v54 = vpack.c.bf16 %v2810_v52, %v2810_v52 }
 0x20a   : > { %v2814_v55 = vpop.permute.xlu0 %2813  ;;  %v1137_v56 = vpop.permute.xlu1 %1136 }
 0x20b   : > { %v1142_v58 = vsel %vm892_vm3, %v1137_v56, 0  ;;  %2615 = vmatmul.mubr.msk.bf16.vlgmr.msra.gmra.mxu1 %vm892_vm3, %v849_v54  ;;  %2621 = vmatmul.mubr.msk.bf16.vlgmr.msra.gmra.mxu0 %vm892_vm3, %v850_v53  ;;  %v2816_v59 = vunpack.i.h.bf16 %v2814_v55  ;;  %v2815_v60 = vunpack.i.l.bf16 %v2814_v55 }
 0x20c   : > { %2625 = vmatpush3.bf16.xpose.msra.mxu1 %v1093_v57  ;;  %2631 = vmatpush3.bf16.xpose.msra.mxu0 %v1142_v58 }
 0x20d   : > { %2626 = vmatprep.mubr.msk.bf16.mxu1 %vm3008_vm1, %v3007_v6  ;;  %2632 = vmatprep.mubr.msk.bf16.mxu0 %vm3008_vm1, %v3007_v6  ;;  %v852_v63 = vpack.c.bf16 %v2816_v59, %v2816_v59  ;;  %v851_v0 = vpack.c.bf16 %v2815_v60, %v2815_v60 }
 0x20e   : > { %2636 = vmatprep.subr.bf16.mxu1 %v3007_v6  ;;  %2642 = vmatprep.subr.bf16.mxu0 %v3007_v6  ;;  %v1235_v62 = vpop.permute.xlu0 %1234 }
 0x20f   : > { %v1186_v61 = vpop.permute.xlu1 %1185  ;;  %v1240_v1 = vsel %vm892_vm3, %v1235_v62, 0 }
 0x210   : > { %v1191_v2 = vsel %vm892_vm3, %v1186_v61, 0 }
 0x213   : > { %v2819_v3 = vpop.permute.xlu1 %2818  ;;  %2627 = vmatmul.mubr.msk.bf16.vlgmr.msra.gmra.mxu1 %vm892_vm3, %v851_v0  ;;  %2633 = vmatmul.mubr.msk.bf16.vlgmr.msra.gmra.mxu0 %vm892_vm3, %v852_v63 }
 0x214   : > { %2637 = vmatpush3.bf16.xpose.msra.mxu1 %v1191_v2  ;;  %2643 = vmatpush3.bf16.xpose.msra.mxu0 %v1240_v1  ;;  %v2821_v4 = vunpack.i.h.bf16 %v2819_v3  ;;  %v2820_v5 = vunpack.i.l.bf16 %v2819_v3 }
 0x215   : > { %2638 = vmatprep.mubr.msk.bf16.mxu1 %vm3008_vm1, %v3007_v6  ;;  %2644 = vmatprep.mubr.msk.bf16.mxu0 %vm3008_vm1, %v3007_v6 }
 0x216   : > { %2648 = vmatprep.subr.bf16.mxu1 %v3007_v6  ;;  %2654 = vmatprep.subr.bf16.mxu0 %v3007_v6  ;;  %v854_v10 = vpack.c.bf16 %v2821_v4, %v2821_v4  ;;  %v853_v11 = vpack.c.bf16 %v2820_v5, %v2820_v5 }
 0x217   : > { %v1379_v7 = vpop.permute.xlu1 %1378 }
 0x218   : > { %v1385_v12 = vsel %vm1383_vm4, %v1379_v7, 0 }
 0x21b   : > { %2639 = vmatmul.mubr.msk.bf16.vlgmr.msra.gmra.mxu1 %vm892_vm3, %v853_v11  ;;  %2645 = vmatmul.mubr.msk.bf16.vlgmr.msra.gmra.mxu0 %vm892_vm3, %v854_v10 }
 0x21c   : > { %2649 = vmatpush3.bf16.msra.mxu1 %v1385_v12  ;;  %2656 = vmatprep.mubr.msk.bf16.mxu0 %vm3008_vm1, %v3007_v6 }
 0x21d   : > { %2650 = vmatprep.mubr.msk.bf16.mxu1 %vm3008_vm1, %v3007_v6  ;;  %2660 = vmatprep.subr.bf16.mxu1 %v3007_v6 }
 0x259   : > { %v933_v18 = vpop.f32.mrf.mxu1 }
 0x25a   : > { %v3334_v19 = vadd.f32 %v933_v18, %v888_v17 }
 0x25b   : > { %v2604_v20 = vpop.f32.mrf.mxu1 }
 0x25c   : > { %v982_v21 = vpop.f32.mrf.mxu0  ;;  %v1282_v22 = vsel %vm892_vm3, %v3334_v19, -inf }
 0x25d   : > { %v983_v24 = vadd.f32 %v982_v21, %v888_v17  ;;  %1283 = vmax.xlane.f32.xlu0 %v1282_v22  ;;  %v936_v25 = vpop.f32.mrf.mxu1 }
 0x25e   : > { %v2610_v26 = vpop.f32.mrf.mxu0 }
 0x25f   : > { %v2605_v27 = vpop.f32.mrf.mxu1  ;;  %v1285_v30 = vsel %vm892_vm3, %v983_v24, -inf }
 0x260   : > { %v985_v31 = vpop.f32.mrf.mxu0  ;;  %1286 = vmax.xlane.f32.xlu1 %v1285_v30 }
 0x262   : > { %v2611_v32 = vpop.f32.mrf.mxu0 }
 0x2cb   : > { %v1031_v33 = vpop.f32.mrf.mxu1  ;;  %v1080_v34 = vpop.f32.mrf.mxu0 }
 0x2cc   : > { %v1032_v36 = vadd.f32 %v1031_v33, %v888_v17  ;;  %v1081_v40 = vadd.f32 %v1080_v34, %v888_v17 }
 0x2cd   : > { %v2616_v37 = vpop.f32.mrf.mxu1  ;;  %v2622_v38 = vpop.f32.mrf.mxu0 }
 0x2ce   : > { %v1288_v41 = vsel %vm892_vm3, %v1032_v36, -inf  ;;  %v1291_v48 = vsel %vm892_vm3, %v1081_v40, -inf }
 0x2cf   : > { %v1083_v43 = vpop.f32.mrf.mxu0  ;;  %1289 = vmax.xlane.f32.xlu0 %v1288_v41  ;;  %v1034_v45 = vpop.f32.mrf.mxu1 }
 0x2d1   : > { %v2617_v46 = vpop.f32.mrf.mxu1  ;;  %v2623_v47 = vpop.f32.mrf.mxu0 }
 0x2d3   : > { %v1178_v49 = vpop.f32.mrf.mxu0  ;;  %1292 = vmax.xlane.f32.xlu0 %v1291_v48  ;;  %v1129_v50 = vpop.f32.mrf.mxu1 }
 0x2d4   : > { %v3341_v51 = vadd.f32 %v1178_v49, %v888_v17  ;;  %v3343_v52 = vadd.f32 %v1129_v50, %v888_v17 }
 0x2d5   : > { %v2628_v53 = vpop.f32.mrf.mxu1  ;;  %v2634_v54 = vpop.f32.mrf.mxu0 }
 0x2d6   : > { %v1297_v55 = vsel %vm892_vm3, %v3341_v51, -inf  ;;  %v1294_v56 = vsel %vm892_vm3, %v3343_v52, -inf }
 0x2d7   : > { %v1181_v57 = vpop.f32.mrf.mxu0  ;;  %1298 = vmax.xlane.f32.xlu0 %v1297_v55  ;;  %1295 = vmax.xlane.f32.xlu1 %v1294_v56  ;;  %v1132_v58 = vpop.f32.mrf.mxu1 }
 0x2d9   : > { %v2629_v59 = vpop.f32.mrf.mxu1  ;;  %v2635_v60 = vpop.f32.mrf.mxu0 }
 0x2db   : > { %v1227_v61 = vpop.f32.mrf.mxu1  ;;  %v1276_v62 = vpop.f32.mrf.mxu0 }
 0x2dc   : > { %v1228_v63 = vadd.f32 %v1227_v61, %v888_v17  ;;  %v1277_v0 = vadd.f32 %v1276_v62, %v888_v17 }
 0x2dd   : > { %v2640_v1 = vpop.f32.mrf.mxu1  ;;  %v2646_v2 = vpop.f32.mrf.mxu0 }
 0x2de   : > { %v1303_v3 = vsel %vm892_vm3, %v1277_v0, -inf  ;;  %v1300_v4 = vsel %vm892_vm3, %v1228_v63, -inf }
 0x2df   : > { %v1279_v5 = vpop.f32.mrf.mxu0  ;;  %1304 = vmax.xlane.f32.xlu0 %v1303_v3  ;;  %1301 = vmax.xlane.f32.xlu1 %v1300_v4  ;;  %v1230_v7 = vpop.f32.mrf.mxu1 }
 0x2e1   : > { %v2641_v10 = vpop.f32.mrf.mxu1  ;;  %v2647_v11 = vpop.f32.mrf.mxu0 }
 0x2e6   : > { %v1284_v15 = vpop.xlane.xlu0 %1283 }
 0x2e7   : > { %v1306_v16 = vsub.f32 %v3334_v19, %v1284_v15 }
 0x2e9   : > { %v1287_v12 = vpop.xlane.xlu1 %1286  ;;  %v1314_v18 = vmul.f32 1.442695, %v1306_v16 }
 0x2ea   : > { %v1307_v13 = vsub.f32 %v983_v24, %v1287_v12 }
 0x2ec   : > { %v1316_v17 = vmul.f32 1.442695, %v1307_v13 }
 0x2ee   : > { %2847 = vpow2.f32 %v1316_v17 }
 0x2ef   : > { %2849 = vpow2.f32 %v1314_v18 }
 0x2f0   : > { %1475 = vrot.lane.b32.xlu1 %v3263_v29, %s3013_s23 }
 0x2f4   : > { %1523 = vrot.lane.b32.xlu1 %v3261_v28, %s3013_s23 }
 0x2f5   : > { %1427 = vrot.lane.b32.xlu0 %v3257_v23, %s3013_s23 }
 0x2fb   : > { %v2848_v20 = vpop.eup %2847 }
 0x2fc   : > { %v1333_v21 = vsel %vm892_vm3, %v2848_v20, 0.0  ;;  %v3359_v22 = vpop.eup %2849 }
 0x2fd   : > { %v1330_v28 = vsel %vm892_vm3, %v3359_v22, 0.0 }
 0x314   : > { %1334 = vadd.xlane.f32.xlu0 %v1333_v21 }
 0x318   : > { %1331 = vadd.xlane.f32.xlu1 %v1330_v28 }
 0x358   : > { %v1290_v23 = vpop.xlane.xlu0 %1289 }
 0x359   : > { %v1308_v29 = vsub.f32 %v1032_v36, %v1290_v23 }
 0x35b   : > { %v1318_v24 = vmul.f32 1.442695, %v1308_v29 }
 0x35c   : > { %v1293_v25 = vpop.xlane.xlu0 %1292 }
 0x35d   : > { %2851 = vpow2.f32 %v1318_v24  ;;  %v1309_v19 = vsub.f32 %v1081_v40, %v1293_v25 }
 0x35f   : > { %v1320_v26 = vmul.f32 1.442695, %v1309_v19 }
 0x360   : > { %v1299_v27 = vpop.xlane.xlu0 %1298  ;;  %v1296_v38 = vpop.xlane.xlu1 %1295 }
 0x361   : > { %2853 = vpow2.f32 %v1320_v26  ;;  %v1310_v40 = vsub.f32 %v3343_v52, %v1296_v38  ;;  %v1311_v43 = vsub.f32 %v3341_v51, %v1299_v27 }
 0x363   : > { %v1322_v45 = vmul.f32 1.442695, %v1310_v40  ;;  %v1324_v47 = vmul.f32 1.442695, %v1311_v43 }
 0x365   : > { %2855 = vpow2.f32 %v1322_v45 }
 0x366   : > { %2857 = vpow2.f32 %v1324_v47 }
 0x368   : > { %v1305_v30 = vpop.xlane.xlu0 %1304  ;;  %v1302_v41 = vpop.xlane.xlu1 %1301 }
 0x369   : > { %v1312_v46 = vsub.f32 %v1228_v63, %v1302_v41  ;;  %v1313_v48 = vsub.f32 %v1277_v0, %v1305_v30 }
 0x36a   : > { %v3363_v31 = vpop.eup %2851 }
 0x36b   : > { %v1336_v32 = vsel %vm892_vm3, %v3363_v31, 0.0  ;;  %v1326_v49 = vmul.f32 1.442695, %v1312_v46  ;;  %v1328_v50 = vmul.f32 1.442695, %v1313_v48 }
 0x36c   : > { %v1428_v33 = vpop.permute.xlu0 %1427  ;;  %1337 = vadd.xlane.f32.xlu1 %v1336_v32  ;;  %v1476_v53 = vpop.permute.xlu1 %1475 }
 0x36d   : > { %v1433_v34 = vsel %vm1383_vm4, %v1428_v33, 0  ;;  %2859 = vpow2.f32 %v1326_v49  ;;  %v1481_v4 = vsel %vm1383_vm4, %v1476_v53, 0 }
 0x36e   : > { %v3368_v37 = vpop.eup %2853  ;;  %2655 = vmatpush3.bf16.msra.mxu0 %v1433_v34  ;;  %2861 = vpow2.f32 %v1328_v50 }
 0x36f   : > { %v1339_v36 = vsel %vm892_vm3, %v3368_v37, 0.0  ;;  %2666 = vmatprep.subr.bf16.mxu0 %v3007_v6 }
 0x370   : > { %1340 = vadd.xlane.f32.xlu0 %v1339_v36  ;;  %v1524_v54 = vpop.permute.xlu1 %1523 }
 0x371   : > { %v1529_v1 = vsel %vm1383_vm4, %v1524_v54, 0 }
 0x37d   : > { %1619 = vrot.lane.b32.xlu1 %v3277_v39, %s3013_s23  ;;  %v3379_v39 = vpop.eup %2855 }
 0x37e   : > { %v3381_v52 = vpop.eup %2857  ;;  %v1342_v51 = vsel %vm892_vm3, %v3379_v39, 0.0 }
 0x37f   : > { %v3385_v55 = vpop.eup %2859  ;;  %v1345_v57 = vsel %vm892_vm3, %v3381_v52, 0.0 }
 0x380   : > { %v1348_v58 = vsel %vm892_vm3, %v3385_v55, 0.0  ;;  %v3391_v59 = vpop.eup %2861 }
 0x381   : > { %v1351_v60 = vsel %vm892_vm3, %v3391_v59, 0.0 }
 0x386   : > { %1571 = vrot.lane.b32.xlu0 %v3270_v35, %s3013_s23 }
 0x39d   : > { %v1335_v35 = vpop.xlane.xlu0 %1334 }
 0x39e   : > { %2863 = vrcp.f32 %v1335_v35 }
 0x3a1   : > { %1343 = vadd.xlane.f32.xlu1 %v1342_v51  ;;  %v1332_v56 = vpop.xlane.xlu1 %1331 }
 0x3a2   : > { %2865 = vrcp.f32 %v1332_v56 }
 0x3a5   : > { %1346 = vadd.xlane.f32.xlu0 %v1345_v57  ;;  %1349 = vadd.xlane.f32.xlu1 %v1348_v58  ;;  %v2839_v58 = vld [vmem:[%s3189_s28 + $0x8] sm:$0xff]  }
 0x3a9   : > { %1352 = vadd.xlane.f32.xlu0 %v1351_v60 }
 0x3ab   : > { %v2864_v61 = vpop.eup %2863 }
 0x3ac   : > { %v1363_v62 = vmul.f32 %v2864_v61, %v2848_v20  ;;  %v2840_v61 = vld [vmem:[%s3189_s28] sm:$0xff]   ;;  %s3017_s28 = smov 24  }
 0x3ae   : > { %v1371_v63 = vpack.c.bf16 %v1363_v62, %v1363_v62 }
 0x3af   : > { %v2866_v0 = vpop.eup %2865 }
 0x3b0   : > { %2657 = vmatmul.mubr.msk.bf16.vlgmr.msra.gmra.mxu0 %vm892_vm3, %v1371_v63  ;;  %v1362_v2 = vmul.f32 %v2866_v0, %v3359_v22 }
 0x3b1   : > { %2667 = vmatpush3.bf16.msra.mxu0 %v1529_v1  ;;  %2668 = vmatprep.mubr.msk.bf16.mxu0 %vm3008_vm1, %v3007_v6 }
 0x3b2   : > { %v1370_v3 = vpack.c.bf16 %v1362_v2, %v1362_v2  ;;  %2678 = vmatprep.subr.bf16.mxu0 %v3007_v6 }
 0x3b4   : > { %2651 = vmatmul.mubr.msk.bf16.vlgmr.msra.gmra.mxu1 %vm892_vm3, %v1370_v3 }
 0x3b5   : > { %2661 = vmatpush3.bf16.msra.mxu1 %v1481_v4  ;;  %2662 = vmatprep.mubr.msk.bf16.mxu1 %vm3008_vm1, %v3007_v6 }
 0x3b6   : > { %1715 = vrot.lane.b32.xlu1 %v3284_v42, %s3013_s23  ;;  %2672 = vmatprep.subr.bf16.mxu1 %v3007_v6 }
 0x3bf   : > { %1667 = vrot.lane.b32.xlu0 %v3288_v44, %s3013_s23 }
 0x3f5   : > { %v1338_v5 = vpop.xlane.xlu1 %1337 }
 0x3f6   : > { %2867 = vrcp.f32 %v1338_v5 }
 0x3f9   : > { %v1341_v7 = vpop.xlane.xlu0 %1340  ;;  %v1620_v17 = vpop.permute.xlu1 %1619 }
 0x3fa   : > { %2869 = vrcp.f32 %v1341_v7  ;;  %v1625_v18 = vsel %vm1383_vm4, %v1620_v17, 0 }
 0x3fd   : > { %v1572_v12 = vpop.permute.xlu0 %1571 }
 0x3fe   : > { %v1577_v16 = vsel %vm1383_vm4, %v1572_v12, 0 }
 0x403   : > { %v2868_v10 = vpop.eup %2867 }
 0x404   : > { %v1364_v11 = vmul.f32 %v2868_v10, %v3363_v31 }
 0x406   : > { %v1372_v13 = vpack.c.bf16 %v1364_v11, %v1364_v11 }
 0x407   : > { %v2870_v15 = vpop.eup %2869 }
 0x408   : > { %2663 = vmatmul.mubr.msk.bf16.vlgmr.msra.gmra.mxu1 %vm892_vm3, %v1372_v13  ;;  %v1365_v42 = vmul.f32 %v2870_v15, %v3368_v37 }
 0x409   : > { %2673 = vmatpush3.bf16.msra.mxu1 %v1577_v16  ;;  %2674 = vmatprep.mubr.msk.bf16.mxu1 %vm3008_vm1, %v3007_v6 }
 0x40a   : > { %v1373_v44 = vpack.c.bf16 %v1365_v42, %v1365_v42  ;;  %2684 = vmatprep.subr.bf16.mxu1 %v3007_v6 }
 0x40c   : > { %2669 = vmatmul.mubr.msk.bf16.vlgmr.msra.gmra.mxu0 %vm892_vm3, %v1373_v44 }
 0x40d   : > { %2679 = vmatpush3.bf16.msra.mxu0 %v1625_v18  ;;  %2680 = vmatprep.mubr.msk.bf16.mxu0 %vm3008_vm1, %v3007_v6 }
 0x40e   : > { %2690 = vmatprep.subr.bf16.mxu0 %v3007_v6 }
 0x42a   : > { %v1344_v20 = vpop.xlane.xlu1 %1343 }
 0x42b   : > { %2871 = vrcp.f32 %v1344_v20 }
 0x42e   : > { %v1347_v21 = vpop.xlane.xlu0 %1346  ;;  %v1350_v22 = vpop.xlane.xlu1 %1349 }
 0x42f   : > { %2873 = vrcp.f32 %v1347_v21 }
 0x430   : > { %2875 = vrcp.f32 %v1350_v22 }
 0x432   : > { %v1353_v28 = vpop.xlane.xlu0 %1352  ;;  %v1716_v31 = vpop.permute.xlu1 %1715 }
 0x433   : > { %2877 = vrcp.f32 %v1353_v28  ;;  %v1721_v37 = vsel %vm1383_vm4, %v1716_v31, 0 }
 0x436   : > { %v1668_v24 = vpop.permute.xlu0 %1667 }
 0x437   : > { %v1673_v27 = vsel %vm1383_vm4, %v1668_v24, 0 }
 0x438   : > { %v2872_v23 = vpop.eup %2871 }
 0x439   : > { %v1366_v29 = vmul.f32 %v2872_v23, %v3379_v39 }
 0x43b   : > { %v1374_v25 = vpack.c.bf16 %v1366_v29, %v1366_v29 }
 0x43c   : > { %v2874_v19 = vpop.eup %2873 }
 0x43d   : > { %v2876_v26 = vpop.eup %2875  ;;  %2675 = vmatmul.mubr.msk.bf16.vlgmr.msra.gmra.mxu1 %vm892_vm3, %v1374_v25  ;;  %v1367_v30 = vmul.f32 %v2874_v19, %v3381_v52 }
 0x43e   : > { %2685 = vmatpush3.bf16.msra.mxu1 %v1673_v27  ;;  %2686 = vmatprep.mubr.msk.bf16.mxu1 %vm3008_vm1, %v3007_v6  ;;  %v1368_v33 = vmul.f32 %v2876_v26, %v3385_v55 }
 0x43f   : > { %v1375_v32 = vpack.c.bf16 %v1367_v30, %v1367_v30  ;;  %2696 = vmatprep.subr.bf16.mxu1 %v3007_v6 }
 0x440   : > { %v2878_v34 = vpop.eup %2877  ;;  %v1376_v36 = vpack.c.bf16 %v1368_v33, %v1368_v33 }
 0x441   : > { %2681 = vmatmul.mubr.msk.bf16.vlgmr.msra.gmra.mxu0 %vm892_vm3, %v1375_v32  ;;  %v1369_v38 = vmul.f32 %v2878_v34, %v3391_v59  ;;  %v2517_v32 = vld [vmem:[%s3603_s1] ss:$0 sm:$0xff] }
 0x442   : > { %2691 = vmatpush3.bf16.msra.mxu0 %v1721_v37  ;;  %2692 = vmatprep.mubr.msk.bf16.mxu0 %vm3008_vm1, %v3007_v6 }
 0x443   : > { %2704 = vmatprep.subr.bf16.mxu0 %v3007_v6  ;;  %v1377_v40 = vpack.c.bf16 %v1369_v38, %v1369_v38 }
 0x445   : > { %2687 = vmatmul.mubr.msk.bf16.vlgmr.msra.gmra.mxu1 %vm892_vm3, %v1376_v36 }
 0x446   : > { %2700 = vmatprep.mubr.msk.bf16.mxu1 %vm3008_vm1, %v3007_v6  ;;  %2697 = vmatpush3.bf16.msra.mxu1 %v2839_v58 }
 0x447   : > { %2698 = vmatprep.subr.bf16.mxu1 %v3007_v6 }
 0x449   : > { %2693 = vmatmul.mubr.msk.bf16.vlgmr.msra.gmra.mxu0 %vm892_vm3, %v1377_v40 }
 0x44a   : > { %2708 = vmatprep.mubr.msk.bf16.mxu0 %vm3008_vm1, %v3007_v6  ;;  %2699 = vmatpush3.bf16.msra.mxu1 %v2840_v61 }
 0x44b   : > { %2712 = vmatprep.subr.bf16.mxu1 %v3007_v6 }
 0x470   : > { %v1469_v41 = vpop.f32.mrf.mxu0 }
 0x472   : > { %v2658_v43 = vpop.f32.mrf.mxu0 }
 0x474   : > { %v1421_v45 = vpop.f32.mrf.mxu1  ;;  %v1472_v46 = vpop.f32.mrf.mxu0 }
 0x476   : > { %v2652_v47 = vpop.f32.mrf.mxu1  ;;  %v2659_v48 = vpop.f32.mrf.mxu0 }
 0x478   : > { %v1424_v49 = vpop.f32.mrf.mxu1 }
 0x47a   : > { %v2653_v50 = vpop.f32.mrf.mxu1 }
 0x4c8   : > { %v1517_v53 = vpop.f32.mrf.mxu1 }
 0x4ca   : > { %v2664_v39 = vpop.f32.mrf.mxu1 }
 0x4cc   : > { %v1520_v54 = vpop.f32.mrf.mxu1  ;;  %v1565_v35 = vpop.f32.mrf.mxu0 }
 0x4cd   : > { %v2822_v52 = vpack.i.bf16 %v1565_v35, %v1517_v53 }
 0x4ce   : > { %v2665_v51 = vpop.f32.mrf.mxu1  ;;  %v2670_v55 = vpop.f32.mrf.mxu0 }
 0x4cf   : > { %2823 = vrot.lane.b32.xlu0 %v2822_v52, %s3015_s24  ;;  %v2842_v51 = vld [vmem:[%s3198_s15] sm:$0xff]   ;;  %v2843_v55 = vld [vmem:[%s3208_s19 + $0x18] sm:$0xff]  }
 0x4d0   : > { %v1568_v56 = vpop.f32.mrf.mxu0 }
 0x4d2   : > { %v2671_v57 = vpop.f32.mrf.mxu0 }
 0x4fd   : > { %v1613_v59 = vpop.f32.mrf.mxu1 }
 0x4ff   : > { %v2676_v60 = vpop.f32.mrf.mxu1 }
 0x501   : > { %v1616_v62 = vpop.f32.mrf.mxu1  ;;  %v1661_v63 = vpop.f32.mrf.mxu0 }
 0x502   : > { %v2827_v0 = vpack.i.bf16 %v1661_v63, %v1613_v59 }
 0x503   : > { %v2677_v1 = vpop.f32.mrf.mxu1  ;;  %v2682_v2 = vpop.f32.mrf.mxu0 }
 0x504   : > { %2828 = vrot.lane.b32.xlu1 %v2827_v0, %s3016_s25  ;;  %v2521_v0 = vld [vmem:[%s724_s16] ss:$0 sm:$0xff] }
 0x505   : > { %v1664_v3 = vpop.f32.mrf.mxu0  ;;  %v1709_v4 = vpop.f32.mrf.mxu1 }
 0x507   : > { %v2683_v5 = vpop.f32.mrf.mxu0  ;;  %v2688_v7 = vpop.f32.mrf.mxu1 }
 0x509   : > { %v1712_v10 = vpop.f32.mrf.mxu1  ;;  %v1757_v11 = vpop.f32.mrf.mxu0 }
 0x50a   : > { %v2832_v12 = vpack.i.bf16 %v1757_v11, %v1709_v4  ;;  %v2522_v4 = vld [vmem:[%s727_s6] ss:$0 sm:$0xff]  ;;  %s3604_s6 = scalar_lea.vmem %s3570_s7, %s3176_s22 }
 0x50b   : > { %v2689_v13 = vpop.f32.mrf.mxu1  ;;  %v2694_v15 = vpop.f32.mrf.mxu0 }
 0x50c   : > { %2833 = vrot.lane.b32.xlu0 %v2832_v12, %s3017_s28  ;;  %v2844_v12 = vld [vmem:[%s3208_s19 + $0x10] sm:$0xff]   ;;  %v2845_v13 = vld [vmem:[%s3208_s19 + $0x8] sm:$0xff]   ;;  %v2846_v15 = vld [vmem:[%s3208_s19] sm:$0xff]   ;;  %s3606_s28 = sld [smem:[#allocation21_spill]] (!%p2535_p4) }
 0x50d   : > { %v1760_v16 = vpop.f32.mrf.mxu0 }
 0x50e   : > { %v2523_v16 = vld [vmem:[%s3604_s6] ss:$0 sm:$0xff] }
 0x50f   : > { %v2695_v42 = vpop.f32.mrf.mxu0 }
 0x541   : > { %v2824_v17 = vpop.permute.xlu0 %2823 }
 0x542   : > { %v2826_v18 = vunpack.i.h.bf16 %v2824_v17  ;;  %v2825_v20 = vunpack.i.l.bf16 %v2824_v17 }
 0x544   : > { %v1788_v23 = vsel %vm892_vm3, %v1469_v41, %v2826_v18  ;;  %v1787_v29 = vsel %vm892_vm3, %v1421_v45, %v2825_v20 }
 0x576   : > { %v2829_v44 = vpop.permute.xlu1 %2828 }
 0x577   : > { %v2831_v21 = vunpack.i.h.bf16 %v2829_v44  ;;  %v2830_v22 = vunpack.i.l.bf16 %v2829_v44 }
 0x579   : > { %v1791_v19 = vsel %vm1789_vm6, %v1788_v23, %v2831_v21  ;;  %v1790_v26 = vsel %vm1789_vm6, %v1787_v29, %v2830_v22 }
 0x57e   : > { %v2834_v28 = vpop.permute.xlu0 %2833 }
 0x57f   : > { %v2836_v24 = vunpack.i.h.bf16 %v2834_v28  ;;  %v2835_v25 = vunpack.i.l.bf16 %v2834_v28 }
 0x581   : > { %v1794_v27 = vsel %vm1792_vm7, %v1791_v19, %v2836_v24  ;;  %v1793_v30 = vsel %vm1792_vm7, %v1790_v26, %v2835_v25 }
 0x582   : > { %v1799_v31 = vpack.c.bf16 %v1794_v27, %v1793_v30 }
 0x584   : > { %2701 = vmatmul.mubr.msk.bf16.vlgmr.msra.gmra.mxu1 %vm780_vm2, %v1799_v31 }
 0x585   : > { %2720 = vmatprep.mubr.msk.bf16.mxu1 %vm3008_vm1, %v3007_v6  ;;  %2713 = vmatpush3.bf16.msra.mxu1 %v2843_v55 }
 0x586   : > { %2714 = vmatprep.subr.bf16.mxu1 %v3007_v6 }
 0x589   : > { %2715 = vmatpush3.bf16.msra.mxu1 %v2844_v12 }
 0x58a   : > { %2716 = vmatprep.subr.bf16.mxu1 %v3007_v6 }
 0x58d   : > { %2717 = vmatpush3.bf16.msra.mxu1 %v2845_v13 }
 0x58e   : > { %2718 = vmatprep.subr.bf16.mxu1 %v3007_v6 }
 0x591   : > { %2719 = vmatpush3.bf16.msra.mxu1 %v2846_v15 }
 0x644   : > { %v1855_v33 = vpop.f32.mrf.mxu1 }
 0x645   : > { %v1856_v34 = vadd.f32 %v2517_v32, %v1855_v33 }
 0x646   : > { %v2702_v37 = vpop.f32.mrf.mxu1 }
 0x647   : > { %v1862_v36 = vadd.f32 %v1856_v34, %v3235_v8 }
 0x648   : > { %v1858_v38 = vpop.f32.mrf.mxu1 }
 0x649   : > { %v1859_v40 = vadd.f32 %v2517_v32, %v1858_v38  ;;  %v1864_v41 = vsel %vm780_vm2, %v1862_v36, 0.0 }
 0x64a   : > { %1865 = vadd.xlane.f32.xlu1 %v1864_v41  ;;  %v2703_v43 = vpop.f32.mrf.mxu1 }
 0x64b   : > { %v1863_v45 = vadd.f32 %v1859_v40, %v3237_v9  ;;  %v2841_v9 = vld [vmem:[%s3198_s15 + $0x8] sm:$0xff]  }
 0x64c   : > { %2705 = vmatpush3.bf16.msra.mxu0 %v2841_v9  ;;  %v2534_v9 = vld [vmem:[%s733_s29] ss:$0 sm:$0xff] }
 0x64d   : > { %v1867_v46 = vsel %vm780_vm2, %v1863_v45, 0.0  ;;  %2706 = vmatprep.subr.bf16.mxu0 %v3007_v6  ;;  %v2527_v6 = vld [vmem:[%s721_s0] ss:$0 sm:$0xff] }
 0x64e   : > { %1868 = vadd.xlane.f32.xlu0 %v1867_v46 }
 0x650   : > { %2707 = vmatpush3.bf16.msra.mxu0 %v2842_v51 }
 0x6d3   : > { %v1866_v47 = vpop.xlane.xlu1 %1865 }
 0x6d4   : > { %v1871_v48 = vmul.f32 0.03125, %v1866_v47 }
 0x6d6   : > { %v1873_v49 = vsub.f32 %v1862_v36, %v1871_v48 }
 0x6d7   : > { %v1869_v50 = vpop.xlane.xlu0 %1868 }
 0x6d8   : > { %v1872_v53 = vmul.f32 0.03125, %v1869_v50  ;;  %v1875_v8 = vmul.f32 %v1873_v49, %v1873_v49 }
 0x6da   : > { %v1874_v39 = vsub.f32 %v1863_v45, %v1872_v53  ;;  %v1877_v54 = vsel %vm780_vm2, %v1875_v8, 0.0 }
 0x6db   : > { %1878 = vadd.xlane.f32.xlu0 %v1877_v54 }
 0x6dc   : > { %v1876_v35 = vmul.f32 %v1874_v39, %v1874_v39 }
 0x6de   : > { %v1880_v52 = vsel %vm780_vm2, %v1876_v35, 0.0  ;;  %v2533_v35 = vld [vmem:[%s730_s27] ss:$0 sm:$0xff]  ;;  %s3605_s27 = sld [smem:[#allocation20_spill]] (!%p2535_p4) }
 0x6df   : > { %1881 = vadd.xlane.f32.xlu1 %v1880_v52 }
 0x764   : > { %v1879_v56 = vpop.xlane.xlu0 %1878 }
 0x765   : > { %v1883_v57 = vmul.f32 0.03125, %v1879_v56 }
 0x767   : > { %v1885_v58 = vadd.f32 1e-05, %v1883_v57 }
 0x768   : > { %v1882_v59 = vpop.xlane.xlu1 %1881 }
 0x769   : > { %2879 = vrsqrt.f32 %v1885_v58  ;;  %v1884_v60 = vmul.f32 0.03125, %v1882_v59 }
 0x76b   : > { %v1886_v61 = vadd.f32 1e-05, %v1884_v60 }
 0x76d   : > { %2881 = vrsqrt.f32 %v1886_v61 }
 0x776   : > { %v2880_v62 = vpop.eup %2879 }
 0x777   : > { %v1889_v63 = vmul.f32 %v2880_v62, %v1873_v49 }
 0x779   : > { %v1897_v3 = vmul.f32 %v2521_v0, %v1889_v63 }
 0x77a   : > { %v2882_v1 = vpop.eup %2881 }
 0x77b   : > { %v1890_v2 = vmul.f32 %v2882_v1, %v1874_v39  ;;  %v1905_v7 = vadd.f32 %v2522_v4, %v1897_v3 }
 0x77d   : > { %v1898_v5 = vmul.f32 %v2521_v0, %v1890_v2 }
 0x77f   : > { %v1906_v10 = vadd.f32 %v2522_v4, %v1898_v5 }
 0x781   : > { %v1911_v11 = vpack.c.bf16 %v1906_v10, %v1905_v7 }
 0x783   : > { %2709 = vmatmul.mubr.msk.bf16.vlgmr.msra.gmra.mxu0 %vm780_vm2, %v1911_v11 }
 0x843   : > { %v1967_v42 = vpop.f32.mrf.mxu0 }
 0x844   : > { %v1968_v44 = vadd.f32 %v2523_v16, %v1967_v42 }
 0x845   : > { %v2710_v17 = vpop.f32.mrf.mxu0 }
 0x846   : > { %v1974_v22 = vmax.f32 %v1968_v44, 0.0 }
 0x847   : > { %v1970_v18 = vpop.f32.mrf.mxu0 }
 0x848   : > { %v1971_v20 = vadd.f32 %v2523_v16, %v1970_v18 }
 0x849   : > { %v2711_v21 = vpop.f32.mrf.mxu0 }
 0x84a   : > { %v1975_v28 = vmax.f32 %v1971_v20, 0.0 }
 0x84c   : > { %v1984_v23 = vpack.c.bf16 %v1975_v28, %v1974_v22 }
 0x84e   : > { %2721 = vmatmul.mubr.msk.bf16.vlgmr.msra.gmra.mxu1 %vm2015_vm8, %v1984_v23 }
 0x90e   : > { %v2053_v29 = vpop.f32.mrf.mxu1 }
 0x90f   : > { %v2054_v24 = vadd.f32 %v2527_v6, %v2053_v29 }
 0x910   : > { %v2722_v25 = vpop.f32.mrf.mxu1 }
 0x911   : > { %v2060_v19 = vadd.f32 %v2054_v24, %v1905_v7 }
 0x912   : > { %v2056_v26 = vpop.f32.mrf.mxu1 }
 0x913   : > { %v2057_v27 = vadd.f32 %v2527_v6, %v2056_v26  ;;  %v2062_v30 = vsel %vm780_vm2, %v2060_v19, 0.0 }
 0x914   : > { %2063 = vadd.xlane.f32.xlu0 %v2062_v30  ;;  %v2723_v31 = vpop.f32.mrf.mxu1 }
 0x915   : > { %v2061_v32 = vadd.f32 %v2057_v27, %v1906_v10 }
 0x917   : > { %v2065_v33 = vsel %vm780_vm2, %v2061_v32, 0.0 }
 0x918   : > { %2066 = vadd.xlane.f32.xlu1 %v2065_v33 }
 0x99d   : > { %v2064_v34 = vpop.xlane.xlu0 %2063 }
 0x99e   : > { %v2068_v37 = vmul.f32 0.03125, %v2064_v34 }
 0x9a0   : > { %v2070_v36 = vsub.f32 %v2060_v19, %v2068_v37 }
 0x9a1   : > { %v2067_v38 = vpop.xlane.xlu1 %2066 }
 0x9a2   : > { %v2069_v40 = vmul.f32 0.03125, %v2067_v38  ;;  %v2072_v41 = vmul.f32 %v2070_v36, %v2070_v36 }
 0x9a4   : > { %v2071_v43 = vsub.f32 %v2061_v32, %v2069_v40  ;;  %v2074_v45 = vsel %vm780_vm2, %v2072_v41, 0.0 }
 0x9a5   : > { %2075 = vadd.xlane.f32.xlu0 %v2074_v45 }
 0x9a6   : > { %v2073_v46 = vmul.f32 %v2071_v43, %v2071_v43 }
 0x9a8   : > { %v2077_v47 = vsel %vm780_vm2, %v2073_v46, 0.0 }
 0x9a9   : > { %2078 = vadd.xlane.f32.xlu1 %v2077_v47 }
 0xa2e   : > { %v2076_v48 = vpop.xlane.xlu0 %2075 }
 0xa2f   : > { %v2080_v49 = vmul.f32 0.03125, %v2076_v48 }
 0xa31   : > { %v2082_v50 = vadd.f32 1e-05, %v2080_v49 }
 0xa32   : > { %v2079_v53 = vpop.xlane.xlu1 %2078 }
 0xa33   : > { %2883 = vrsqrt.f32 %v2082_v50  ;;  %v2081_v8 = vmul.f32 0.03125, %v2079_v53 }
 0xa35   : > { %v2083_v39 = vadd.f32 1e-05, %v2081_v8 }
 0xa37   : > { %2885 = vrsqrt.f32 %v2083_v39 }
 0xa40   : > { %v2884_v54 = vpop.eup %2883 }
 0xa41   : > { %v2086_v52 = vmul.f32 %v2884_v54, %v2070_v36 }
 0xa43   : > { %v2094_v51 = vmul.f32 %v2533_v35, %v2086_v52 }
 0xa44   : > { %v2886_v55 = vpop.eup %2885 }
 0xa45   : > { %v2102_v56 = vadd.f32 %v2534_v9, %v2094_v51  ;;  %v2087_v57 = vmul.f32 %v2886_v55, %v2071_v43 }
 0xa47   : > { %2104 = vst.msk [vmem:[#allocation2] sm:$0xff] %vm780_vm2, %v2102_v56  ;;  %v2095_v58 = vmul.f32 %v2533_v35, %v2087_v57  ;;  %2109 = sbr.rel (%p2535_p4) target bundleno = 2960 (0xb90), region = 100 }
 0xa49   : > { %v2103_v59 = vadd.f32 %v2534_v9, %v2095_v58 }
 0xa4b   : > { %2105 = vst.msk [vmem:[#allocation2 + $0x8] sm:$0xff] %vm780_vm2, %v2103_v59 }
 0xa4c   : > { %v2112_v60 = vsel %vm780_vm2, %v2102_v56, 0.0  ;;  %v2115_v61 = vsel %vm780_vm2, %v2103_v59, 0.0  ;;  %v3018_v17 = vmov 1966171168   ;;  %v2536_v21 = vld [vmem:[%s3605_s27] ss:$0 sm:$0xff] }
 0xa4d   : > { %2113 = vadd.xlane.f32.xlu0 %v2112_v60  ;;  %v2157_v44 = vunpack.c.l.s4 %v3018_v17  ;;  %v2537_v28 = vld [vmem:[%s3606_s28] ss:$0 sm:$0xff]  ;;  %vm2212_vm9 = vcmask 253952  }
 0xa4f   : > { %v2158_v18 = vunpack.c.0.s8 %v2157_v44 }
 0xa51   : > { %2116 = vadd.xlane.f32.xlu0 %v2115_v61  ;;  %v2161_v23 = vsub.s32 %v2158_v18, %v3331_v14 }
 0xad6   : > { %v2114_v62 = vpop.xlane.xlu0 %2113 }
 0xad7   : > { %v2118_v63 = vmul.f32 0.03125, %v2114_v62 }
 0xad9   : > { %v2120_v0 = vsub.f32 %v2102_v56, %v2118_v63 }
 0xada   : > { %v2117_v1 = vpop.xlane.xlu0 %2116 }
 0xadb   : > { %v2119_v2 = vmul.f32 0.03125, %v2117_v1  ;;  %v2122_v3 = vmul.f32 %v2120_v0, %v2120_v0 }
 0xadd   : > { %v2121_v4 = vsub.f32 %v2103_v59, %v2119_v2  ;;  %v2124_v5 = vsel %vm780_vm2, %v2122_v3, 0.0 }
 0xade   : > { %2125 = vadd.xlane.f32.xlu1 %v2124_v5 }
 0xadf   : > { %v2123_v7 = vmul.f32 %v2121_v4, %v2121_v4 }
 0xae1   : > { %v2127_v10 = vsel %vm780_vm2, %v2123_v7, 0.0 }
 0xae2   : > { %2128 = vadd.xlane.f32.xlu1 %v2127_v10 }
 0xb67   : > { %v2126_v11 = vpop.xlane.xlu1 %2125 }
 0xb68   : > { %v2130_v12 = vmul.f32 0.03125, %v2126_v11 }
 0xb6a   : > { %v2132_v13 = vadd.f32 1e-05, %v2130_v12 }
 0xb6b   : > { %v2129_v15 = vpop.xlane.xlu1 %2128 }
 0xb6c   : > { %2887 = vrsqrt.f32 %v2132_v13  ;;  %v2131_v16 = vmul.f32 0.03125, %v2129_v15 }
 0xb6e   : > { %v2133_v42 = vadd.f32 1e-05, %v2131_v16 }
 0xb70   : > { %2889 = vrsqrt.f32 %v2133_v42 }
 0xb79   : > { %v2888_v20 = vpop.eup %2887 }
 0xb7a   : > { %v2136_v22 = vmul.f32 %v2888_v20, %v2120_v0 }
 0xb7c   : > { %v2144_v6 = vmul.f32 %v2536_v21, %v2136_v22 }
 0xb7d   : > { %v2890_v29 = vpop.eup %2889 }
 0xb7e   : > { %v2152_v24 = vadd.f32 %v2537_v28, %v2144_v6  ;;  %v2137_v25 = vmul.f32 %v2890_v29, %v2121_v4 }
 0xb80   : > { %v2155_v19 = vcombine.high %v2152_v24, %v2152_v24  ;;  %v2162_v26 = vrot.slane %v2152_v24, %v2161_v23  ;;  %v2145_v27 = vmul.f32 %v2536_v21, %v2137_v25 }
 0xb82   : > { %v2169_v30 = vrot.slane %v2155_v19, %v2161_v23  ;;  %v2170_v31 = vcombine.high %v2162_v26, %v2162_v26  ;;  %v2178_v32 = vrot.slane %v2162_v26, %v2161_v23  ;;  %v2153_v33 = vadd.f32 %v2537_v28, %v2145_v27 }
 0xb84   : > { %v2171_v34 = vcombine.high %v2169_v30, %v2169_v30  ;;  %v2185_v37 = vrot.slane %v2169_v30, %v2161_v23  ;;  %v2192_v36 = vrot.slane %v2170_v31, %v2161_v23  ;;  %v2200_v38 = vcombine.high %v2178_v32, %v2178_v32  ;;  %2213 = vst.msk [vmem:[#allocation8] sm:$0x1] %vm2212_vm9, %v2178_v32 }
 0xb85   : > { %v2222_v40 = vcombine.high %v2153_v33, %v2153_v33  ;;  %v2229_v14 = vrot.slane %v2153_v33, %v2161_v23 }
 0xb86   : > { %v2199_v41 = vrot.slane %v2171_v34, %v2161_v23  ;;  %v2201_v43 = vcombine.high %v2185_v37, %v2185_v37  ;;  %v2202_v45 = vcombine.high %v2192_v36, %v2192_v36  ;;  %2214 = vst.msk [vmem:[#allocation8 + $0x2] sm:$0x1] %vm2212_vm9, %v2192_v36  ;;  %2215 = vst.msk [vmem:[#allocation8 + $0x4] sm:$0x1] %vm2212_vm9, %v2200_v38 }
 0xb87   : > { %2217 = vst.msk [vmem:[#allocation8 + $0x8] sm:$0x1] %vm2212_vm9, %v2185_v37  ;;  %v2236_v46 = vrot.slane %v2222_v40, %v2161_v23  ;;  %v2237_v47 = vcombine.high %v2229_v14, %v2229_v14  ;;  %v2245_v48 = vrot.slane %v2229_v14, %v2161_v23 }
 0xb88   : > { %v2203_v49 = vcombine.high %v2199_v41, %v2199_v41  ;;  %2216 = vst.msk [vmem:[#allocation8 + $0x6] sm:$0x1] %vm2212_vm9, %v2202_v45  ;;  %2218 = vst.msk [vmem:[#allocation8 + $0xa] sm:$0x1] %vm2212_vm9, %v2199_v41 }
 0xb89   : > { %2219 = vst.msk [vmem:[#allocation8 + $0xc] sm:$0x1] %vm2212_vm9, %v2201_v43  ;;  %v2238_v50 = vcombine.high %v2236_v46, %v2236_v46  ;;  %v2252_v53 = vrot.slane %v2236_v46, %v2161_v23  ;;  %v2259_v8 = vrot.slane %v2237_v47, %v2161_v23  ;;  %v2267_v39 = vcombine.high %v2245_v48, %v2245_v48 }
 0xb8a   : > { %2279 = vst.msk [vmem:[#allocation8 + $0x1] sm:$0x1] %vm2212_vm9, %v2245_v48  ;;  %2220 = vst.msk [vmem:[#allocation8 + $0xe] sm:$0x1] %vm2212_vm9, %v2203_v49 }
 0xb8b   : > { %v2266_v54 = vrot.slane %v2238_v50, %v2161_v23  ;;  %v2268_v35 = vcombine.high %v2252_v53, %v2252_v53  ;;  %v2269_v52 = vcombine.high %v2259_v8, %v2259_v8  ;;  %2280 = vst.msk [vmem:[#allocation8 + $0x3] sm:$0x1] %vm2212_vm9, %v2259_v8  ;;  %2281 = vst.msk [vmem:[#allocation8 + $0x5] sm:$0x1] %vm2212_vm9, %v2267_v39 }
 0xb8c   : > { %2283 = vst.msk [vmem:[#allocation8 + $0x9] sm:$0x1] %vm2212_vm9, %v2252_v53 }
 0xb8d   : > { %v2270_v9 = vcombine.high %v2266_v54, %v2266_v54  ;;  %2282 = vst.msk [vmem:[#allocation8 + $0x7] sm:$0x1] %vm2212_vm9, %v2269_v52  ;;  %2284 = vst.msk [vmem:[#allocation8 + $0xb] sm:$0x1] %vm2212_vm9, %v2266_v54 }
 0xb8e   : > { %2285 = vst.msk [vmem:[#allocation8 + $0xd] sm:$0x1] %vm2212_vm9, %v2268_v35 }
 0xb8f   : > { %2286 = vst.msk [vmem:[#allocation8 + $0xf] sm:$0x1] %vm2212_vm9, %v2270_v9 }
 0xb90 PF: > { %s3607_s26 = sld [smem:[#allocation13_spill]]  ;;  %s3019_s15 = smov [#allocation8]  }
 0xb91   : > { %s2295_s4 = sshll.u32 %s3019_s15, 4  ;;  %s2296_s4 = int_to_ptr.vmem [resolvable:$true] %s2295_s4 }
 0xb92   : > { %s2943_s14 = scalar_lea.vmem %s2296_s4, 256  ;;  %p2950_p1 = scmp.lt.s32.totalorder %s2296_s4, %s2296_s4 }
 0xb93   : > { %p2944_p12 = scmp.ne.s32.totalorder %s2296_s4, %s2943_s14  ;;  %p2951_p2 = scmp.lt.s32.totalorder %s2943_s14, %s2943_s14 }
 0xb95   : > { %p2952_p5 = por %p2951_p2, %p2950_p1 }
 0xb96   : > { %s3608_s2 = sadd.s32 4294967295, %s3607_s26  }
 0xb97   : > { %p3539_p6 = scmp.eq.s32.totalorder %s3608_s2, 1 }
 0xb99   : > { %p2945_p13 = pnand %p2944_p12, %p3539_p6 }
 0xb9b   : > { %p2946_p0 = pneg %p2945_p13 }
 0xb9d   : > { %p2953_p8 = pnand %p2952_p5, %p2946_p0 }
 0xb9f   : > { %2956 = shalt.err (!%p2953_p8)
}
 0xba0   : > { %s3020_s17 = smov 32   ;;  %s3021_s16 = smov 2  }
 0xba1   : > { %s3610_s20 = sld [smem:[#allocation22_spill]] }
 0xba7   : > { %2733 = dma.vmem_to_hbm [thread:$0]  (%p3539_p6), %s2296_s4, 256, %s3610_s20, [#allocation5], %s3020_s17, %s3020_s17, %s3021_s16  }
 0xba8   : > { %2988 = dma.done.wait (%p3539_p6), [#allocation5], 256  }
 0xba9   : > { %2990 = vsyncadd (%p3539_p6), [#allocation5], 4294967040 }
 0xbaa PF: > { %s3611_s18 = sld [smem:[#allocation13_spill]] }
 0xbab   : > { %s3612_s21 = sld [smem:[#allocation12_spill]] }
 0xbac   : > { %s3613_s22 = sld [smem:[#allocation14_spill]] }
 0xbb0   : > { %s29_s23 = sadd.s32 1, %s3611_s18  }
 0xbb1   : > { %p26_p9 = scmp.ge.s32.totalorder %s29_s23, 4  }
 0xbb3   :  { %28 = sbr.rel (!%p26_p9) target bundleno = 13 (0xd), region = 163 }
 0xbb8   :  { %2311 = vsyncpa [#allocation4], 1 }
 0xbb9   :  { %2313 = vsyncpa [#allocation4 + $0x1], 1 }
 0xbba   :  { %2314 = vsyncpa [#allocation7], 1 }
 0xbbb   :  { %2315 = vsyncpa [#allocation5], 1 }
 0xbbc   :  { %2317 = vsyncpa [#allocation5 + $0x1], 1 }

</bundles_post_ra>
